<compile_context>
chip_gen: v6e
topology: v6e:2x2x1
jax: 0.10.0
libtpu: 0.0.40
codegen_flags: <defaults>
</compile_context>

<pallas_src>
import functools

import jax
import jax.numpy as jnp
from jax.experimental import pallas as pl
from jax.experimental.pallas import tpu as pltpu


def _frame_dims(H, W):
    """Flattened padded-frame geometry: lane row stride Wp (pow2 >= W+2) and
    Hp rows rounded up so P = Hp*Wp is a multiple of 128 (lane-dense)."""
    Wp = pl.next_power_of_2(W + 2)
    Hp = H + 2
    while (Hp * Wp) % 128:
        Hp += 1
    return Hp, Wp


def _fused_trigger_kernel(x_ref, mask_ref, w1_ref, b1_ref, w2_ref, b2_ref,
                          w3_ref, b3_ref, o_ref, abuf, rbuf, *, Wp, P, left):
    # x_ref : (1, 8, P)   input frame, flattened (Hp*Wp), channels padded 3->8
    # mask  : (1, P)      1.0 on interior pixels, 0.0 on halo/extra positions
    # wK    : (CoutK, 9*CinK) im2col weights ; bK : (CoutK, 1)
    # o_ref : (1, 3, P)
    # abuf  : (16, left+P+left) VMEM halo buffer for lane-shifted tap extraction
    # rbuf  : (144, P)    VMEM im2col operand (9*Cin rows used per layer)
    mask = mask_ref[...]                                        # (1, P)

    # Zero the halo buffer once; taps that fall outside the frame read zeros.
    abuf[...] = jnp.zeros_like(abuf)

    def conv3x3(a, cin, w_ref, b_ref, relu, remask):
        # a: (cin, P) activation in flattened-padded layout (zero off-interior)
        abuf[0:cin, left:left + P] = a          # aligned store (left % 128 == 0)
        t = 0
        for dy in range(3):
            for dx in range(3):
                off = left + (dy - 1) * Wp + (dx - 1)
                # Whole-slab lane-offset copy: rows [t*cin, (t+1)*cin) of rbuf
                # hold `a` shifted by (dy-1, dx-1) in the flattened frame.
                rbuf[t * cin:(t + 1) * cin, :] = abuf[0:cin, off:off + P]
                t += 1
        r = rbuf[0:9 * cin, :]                                  # (9*cin, P)
        acc = jnp.dot(w_ref[...], r, preferred_element_type=jnp.float32)
        acc = acc + b_ref[...]                                  # (cout,1) bcast
        if relu:
            acc = jnp.maximum(acc, 0.0)
        if remask:
            acc = acc * mask            # restore zero padding for next layer
        return acc

    a0 = x_ref[0]                                                    # (8, P)
    a1 = conv3x3(a0, 8, w1_ref, b1_ref, relu=True, remask=True)      # (8, P)
    a2 = conv3x3(a1, 8, w2_ref, b2_ref, relu=True, remask=True)      # (16, P)
    a3 = conv3x3(a2, 16, w3_ref, b3_ref, relu=False, remask=False)   # (3, P)
    o_ref[0, :, :] = a3.astype(o_ref.dtype)


def _pack_conv_params(w, b, cin_pad):
    """PyTorch-layout weights (Cout, Cin, 3, 3) -> im2col weights
    (Cout, 9*cin_pad) matching the kernel's (tap, channel) ordering."""
    cout, cin, kh, kw = w.shape
    w = jnp.pad(w, ((0, 0), (0, cin_pad - cin), (0, 0), (0, 0)))
    w = jnp.transpose(w, (0, 2, 3, 1)).reshape(cout, kh * kw * cin_pad)
    return w.astype(jnp.float32), b.reshape(cout, 1).astype(jnp.float32)


@jax.jit
def trigger_generator_forward(z, params):
    # z: (N, 3, H, W) float32, NCHW like the PyTorch module.
    N, C, H, W = z.shape
    Hp, Wp = _frame_dims(H, W)
    P = Hp * Wp
    left = pl.cdiv(Wp + 1, 128) * 128      # 128-aligned halo margin (>= Wp+1)

    # One-time zero pad of the network input into the flattened frame layout
    # (channels padded 3->8 so every im2col tap block is sublane-aligned).
    xp = jnp.pad(z.astype(jnp.float32),
                 ((0, 0), (0, 8 - C), (1, Hp - H - 1), (1, Wp - W - 1)))
    xp = xp.reshape(N, 8, P)

    # Interior mask in the flattened frame layout (resident across the grid).
    mask = jnp.zeros((Hp, Wp), jnp.float32).at[1:H + 1, 1:W + 1].set(1.0)
    mask = mask.reshape(1, P)

    w1, b1 = _pack_conv_params(params["w1"], params["b1"], 8)     # (8, 72)
    w2, b2 = _pack_conv_params(params["w2"], params["b2"], 8)     # (16, 72)
    w3, b3 = _pack_conv_params(params["w3"], params["b3"], 16)    # (3, 144)

    kernel = functools.partial(_fused_trigger_kernel, Wp=Wp, P=P, left=left)

    out_flat = pl.pallas_call(
        kernel,
        out_shape=jax.ShapeDtypeStruct((N, 3, P), jnp.float32),
        grid_spec=pltpu.PrefetchScalarGridSpec(
            num_scalar_prefetch=0,
            grid=(N,),
            in_specs=[
                pl.BlockSpec((1, 8, P), lambda n: (n, 0, 0)),   # input frame
                pl.BlockSpec((1, P), lambda n: (0, 0)),         # interior mask
                pl.BlockSpec((8, 72), lambda n: (0, 0)),        # w1 (im2col)
                pl.BlockSpec((8, 1), lambda n: (0, 0)),         # b1
                pl.BlockSpec((16, 72), lambda n: (0, 0)),       # w2
                pl.BlockSpec((16, 1), lambda n: (0, 0)),        # b2
                pl.BlockSpec((3, 144), lambda n: (0, 0)),       # w3
                pl.BlockSpec((3, 1), lambda n: (0, 0)),         # b3
            ],
            out_specs=pl.BlockSpec((1, 3, P), lambda n: (n, 0, 0)),
            scratch_shapes=[
                pltpu.VMEM((16, left + P + left), jnp.float32),  # halo buffer
                pltpu.VMEM((144, P), jnp.float32),               # im2col operand
            ]),
        compiler_params=pltpu.CompilerParams(
            dimension_semantics=("parallel",)),
    )(xp, mask, w1, b1, w2, b2, w3, b3)

    # Un-flatten the frame and crop the interior: (N, 3, P) -> (N, 3, H, W).
    return out_flat.reshape(N, 3, Hp, Wp)[:, :, 1:H + 1, 1:W + 1]


def init_params(key):
    """Deterministic parameter init; PyTorch layout (Cout, Cin, KH, KW)."""
    ks = jax.random.split(key, 6)
    s = 0.1
    return {
        "w1": s * jax.random.normal(ks[0], (8, 3, 3, 3), jnp.float32),
        "b1": s * jax.random.normal(ks[1], (8,), jnp.float32),
        "w2": s * jax.random.normal(ks[2], (16, 8, 3, 3), jnp.float32),
        "b2": s * jax.random.normal(ks[3], (16,), jnp.float32),
        "w3": s * jax.random.normal(ks[4], (3, 16, 3, 3), jnp.float32),
        "b3": s * jax.random.normal(ks[5], (3,), jnp.float32),
    }


def _reference_forward(z, params):
    """Pure-JAX reference (lax.conv, NCHW/OIHW) for a correctness check."""
    def conv(x, w, b, relu):
        y = jax.lax.conv_general_dilated(
            x, w, window_strides=(1, 1), padding=((1, 1), (1, 1)),
            dimension_numbers=("NCHW", "OIHW", "NCHW"),
            precision=jax.lax.Precision.HIGHEST)
        y = y + b[None, :, None, None]
        return jnp.maximum(y, 0.0) if relu else y

    z = conv(z, params["w1"], params["b1"], True)
    z = conv(z, params["w2"], params["b2"], True)
    z = conv(z, params["w3"], params["b3"], False)
    return z


if __name__ == "__main__":
    key = jax.random.PRNGKey(0)
    k_x, k_p = jax.random.split(key)

    # Small deterministic input, NCHW like the PyTorch module expects.
    x = jax.random.normal(k_x, (2, 3, 16, 16), jnp.float32)
    params = init_params(k_p)

    out = trigger_generator_forward(x, params)
    out = jax.block_until_ready(out)

    ref = _reference_forward(x, params)
    assert out.shape == (2, 3, 16, 16)
    assert jnp.allclose(out, ref, atol=2e-3, rtol=2e-3), "mismatch vs reference"

    print("KERNEL_OK")
</pallas_src>

<mosaic_0001>
module attributes {stable_mosaic.version = 11 : i64} {
  func.func @_fused_trigger_kernel(%arg0: i32, %arg1: memref<1x8x640xf32, #tpu.memory_space<vmem>>, %arg2: memref<1x640xf32, #tpu.memory_space<vmem>>, %arg3: memref<8x72xf32, #tpu.memory_space<vmem>>, %arg4: memref<8x1xf32, #tpu.memory_space<vmem>>, %arg5: memref<16x72xf32, #tpu.memory_space<vmem>>, %arg6: memref<16x1xf32, #tpu.memory_space<vmem>>, %arg7: memref<3x144xf32, #tpu.memory_space<vmem>>, %arg8: memref<3x1xf32, #tpu.memory_space<vmem>>, %arg9: memref<1x3x640xf32, #tpu.memory_space<vmem>>, %arg10: memref<16x896xf32, #tpu.memory_space<vmem>>, %arg11: memref<144x640xf32, #tpu.memory_space<vmem>>) attributes {dimension_semantics = [#tpu.dimension_semantics<parallel>], iteration_bounds = array<i64: 2>, scalar_prefetch = 0 : i64, scratch_operands = 2 : i64, tpu.core_type = #tpu.core_type<tc>, window_params = [{transform_indices = @transform_0, window_bounds = array<i64: 1, 8, 640>}, {pipeline_mode = #tpu.pipeline_mode<synchronous>, transform_indices = @transform_1, window_bounds = array<i64: 1, 640>}, {pipeline_mode = #tpu.pipeline_mode<synchronous>, transform_indices = @transform_2, window_bounds = array<i64: 8, 72>}, {pipeline_mode = #tpu.pipeline_mode<synchronous>, transform_indices = @transform_3, window_bounds = array<i64: 8, 1>}, {pipeline_mode = #tpu.pipeline_mode<synchronous>, transform_indices = @transform_4, window_bounds = array<i64: 16, 72>}, {pipeline_mode = #tpu.pipeline_mode<synchronous>, transform_indices = @transform_5, window_bounds = array<i64: 16, 1>}, {pipeline_mode = #tpu.pipeline_mode<synchronous>, transform_indices = @transform_6, window_bounds = array<i64: 3, 144>}, {pipeline_mode = #tpu.pipeline_mode<synchronous>, transform_indices = @transform_7, window_bounds = array<i64: 3, 1>}, {transform_indices = @transform_8, window_bounds = array<i64: 1, 3, 640>}]} {
    %c0 = arith.constant 0 : index
    %c0_0 = arith.constant 0 : index
    %0 = vector.load %arg2[%c0, %c0_0] : memref<1x640xf32, #tpu.memory_space<vmem>>, vector<1x640xf32>
    %cst = arith.constant 0.000000e+00 : f32
    %1 = vector.broadcast %cst : f32 to vector<16x896xf32>
    %c0_1 = arith.constant 0 : index
    %c0_2 = arith.constant 0 : index
    %2 = vector.load %arg10[%c0_1, %c0_2] : memref<16x896xf32, #tpu.memory_space<vmem>>, vector<16x896xf32>
    tpu.vector_store %arg10[%c0_1, %c0_2], %1 {strides = array<i32>} : memref<16x896xf32, #tpu.memory_space<vmem>>, vector<16x896xf32>,
    %c0_3 = arith.constant 0 : index
    %c0_4 = arith.constant 0 : index
    %c0_5 = arith.constant 0 : index
    %3 = vector.load %arg1[%c0_3, %c0_4, %c0_5] : memref<1x8x640xf32, #tpu.memory_space<vmem>>, vector<1x8x640xf32>
    %4 = vector.shape_cast %3 : vector<1x8x640xf32> to vector<8x640xf32>
    %c0_6 = arith.constant 0 : index
    %c128 = arith.constant 128 : index
    %5 = vector.load %arg10[%c0_6, %c128] : memref<16x896xf32, #tpu.memory_space<vmem>>, vector<8x640xf32>
    tpu.vector_store %arg10[%c0_6, %c128], %4 {strides = array<i32>} : memref<16x896xf32, #tpu.memory_space<vmem>>, vector<8x640xf32>,
    %c0_7 = arith.constant 0 : index
    %c95 = arith.constant 95 : index
    %6 = vector.load %arg10[%c0_7, %c95] : memref<16x896xf32, #tpu.memory_space<vmem>>, vector<8x640xf32>
    %c0_8 = arith.constant 0 : index
    %c0_9 = arith.constant 0 : index
    %7 = vector.load %arg11[%c0_8, %c0_9] : memref<144x640xf32, #tpu.memory_space<vmem>>, vector<8x640xf32>
    tpu.vector_store %arg11[%c0_8, %c0_9], %6 {strides = array<i32>} : memref<144x640xf32, #tpu.memory_space<vmem>>, vector<8x640xf32>,
    %c0_10 = arith.constant 0 : index
    %c96 = arith.constant 96 : index
    %8 = vector.load %arg10[%c0_10, %c96] : memref<16x896xf32, #tpu.memory_space<vmem>>, vector<8x640xf32>
    %c8 = arith.constant 8 : index
    %c0_11 = arith.constant 0 : index
    %9 = vector.load %arg11[%c8, %c0_11] : memref<144x640xf32, #tpu.memory_space<vmem>>, vector<8x640xf32>
    tpu.vector_store %arg11[%c8, %c0_11], %8 {strides = array<i32>} : memref<144x640xf32, #tpu.memory_space<vmem>>, vector<8x640xf32>,
    %c0_12 = arith.constant 0 : index
    %c97 = arith.constant 97 : index
    %10 = vector.load %arg10[%c0_12, %c97] : memref<16x896xf32, #tpu.memory_space<vmem>>, vector<8x640xf32>
    %c16 = arith.constant 16 : index
    %c0_13 = arith.constant 0 : index
    %11 = vector.load %arg11[%c16, %c0_13] : memref<144x640xf32, #tpu.memory_space<vmem>>, vector<8x640xf32>
    tpu.vector_store %arg11[%c16, %c0_13], %10 {strides = array<i32>} : memref<144x640xf32, #tpu.memory_space<vmem>>, vector<8x640xf32>,
    %c0_14 = arith.constant 0 : index
    %c127 = arith.constant 127 : index
    %12 = vector.load %arg10[%c0_14, %c127] : memref<16x896xf32, #tpu.memory_space<vmem>>, vector<8x640xf32>
    %c24 = arith.constant 24 : index
    %c0_15 = arith.constant 0 : index
    %13 = vector.load %arg11[%c24, %c0_15] : memref<144x640xf32, #tpu.memory_space<vmem>>, vector<8x640xf32>
    tpu.vector_store %arg11[%c24, %c0_15], %12 {strides = array<i32>} : memref<144x640xf32, #tpu.memory_space<vmem>>, vector<8x640xf32>,
    %c0_16 = arith.constant 0 : index
    %c128_17 = arith.constant 128 : index
    %14 = vector.load %arg10[%c0_16, %c128_17] : memref<16x896xf32, #tpu.memory_space<vmem>>, vector<8x640xf32>
    %c32 = arith.constant 32 : index
    %c0_18 = arith.constant 0 : index
    %15 = vector.load %arg11[%c32, %c0_18] : memref<144x640xf32, #tpu.memory_space<vmem>>, vector<8x640xf32>
    tpu.vector_store %arg11[%c32, %c0_18], %14 {strides = array<i32>} : memref<144x640xf32, #tpu.memory_space<vmem>>, vector<8x640xf32>,
    %c0_19 = arith.constant 0 : index
    %c129 = arith.constant 129 : index
    %16 = vector.load %arg10[%c0_19, %c129] : memref<16x896xf32, #tpu.memory_space<vmem>>, vector<8x640xf32>
    %c40 = arith.constant 40 : index
    %c0_20 = arith.constant 0 : index
    %17 = vector.load %arg11[%c40, %c0_20] : memref<144x640xf32, #tpu.memory_space<vmem>>, vector<8x640xf32>
    tpu.vector_store %arg11[%c40, %c0_20], %16 {strides = array<i32>} : memref<144x640xf32, #tpu.memory_space<vmem>>, vector<8x640xf32>,
    %c0_21 = arith.constant 0 : index
    %c159 = arith.constant 159 : index
    %18 = vector.load %arg10[%c0_21, %c159] : memref<16x896xf32, #tpu.memory_space<vmem>>, vector<8x640xf32>
    %c48 = arith.constant 48 : index
    %c0_22 = arith.constant 0 : index
    %19 = vector.load %arg11[%c48, %c0_22] : memref<144x640xf32, #tpu.memory_space<vmem>>, vector<8x640xf32>
    tpu.vector_store %arg11[%c48, %c0_22], %18 {strides = array<i32>} : memref<144x640xf32, #tpu.memory_space<vmem>>, vector<8x640xf32>,
    %c0_23 = arith.constant 0 : index
    %c160 = arith.constant 160 : index
    %20 = vector.load %arg10[%c0_23, %c160] : memref<16x896xf32, #tpu.memory_space<vmem>>, vector<8x640xf32>
    %c56 = arith.constant 56 : index
    %c0_24 = arith.constant 0 : index
    %21 = vector.load %arg11[%c56, %c0_24] : memref<144x640xf32, #tpu.memory_space<vmem>>, vector<8x640xf32>
    tpu.vector_store %arg11[%c56, %c0_24], %20 {strides = array<i32>} : memref<144x640xf32, #tpu.memory_space<vmem>>, vector<8x640xf32>,
    %c0_25 = arith.constant 0 : index
    %c161 = arith.constant 161 : index
    %22 = vector.load %arg10[%c0_25, %c161] : memref<16x896xf32, #tpu.memory_space<vmem>>, vector<8x640xf32>
    %c64 = arith.constant 64 : index
    %c0_26 = arith.constant 0 : index
    %23 = vector.load %arg11[%c64, %c0_26] : memref<144x640xf32, #tpu.memory_space<vmem>>, vector<8x640xf32>
    tpu.vector_store %arg11[%c64, %c0_26], %22 {strides = array<i32>} : memref<144x640xf32, #tpu.memory_space<vmem>>, vector<8x640xf32>,
    %c0_27 = arith.constant 0 : index
    %c0_28 = arith.constant 0 : index
    %24 = vector.load %arg11[%c0_27, %c0_28] : memref<144x640xf32, #tpu.memory_space<vmem>>, vector<72x640xf32>
    %c0_29 = arith.constant 0 : index
    %c0_30 = arith.constant 0 : index
    %25 = vector.load %arg3[%c0_29, %c0_30] : memref<8x72xf32, #tpu.memory_space<vmem>>, vector<8x72xf32>
    %cst_31 = arith.constant dense<0.000000e+00> : vector<8x640xf32>
    %26 = tpu.matmul %25, %24, %cst_31 {dimension_numbers = #tpu.dot_dimension_numbers<[1], [0], [0], [1], [0, 0, 1, 1], [], []>} : vector<8x72xf32>, vector<72x640xf32>, vector<8x640xf32> -> vector<8x640xf32>
    %c0_32 = arith.constant 0 : index
    %c0_33 = arith.constant 0 : index
    %27 = vector.load %arg4[%c0_32, %c0_33] : memref<8x1xf32, #tpu.memory_space<vmem>>, vector<8x1xf32>
    %28 = vector.broadcast %27 : vector<8x1xf32> to vector<8x640xf32>
    %29 = arith.addf %26, %28 : vector<8x640xf32>
    %cst_34 = arith.constant 0.000000e+00 : f32
    %30 = vector.broadcast %cst_34 : f32 to vector<8x640xf32>
    %31 = arith.maximumf %29, %30 : vector<8x640xf32>
    %32 = vector.broadcast %0 : vector<1x640xf32> to vector<8x640xf32>
    %33 = arith.mulf %31, %32 : vector<8x640xf32>
    %c0_35 = arith.constant 0 : index
    %c128_36 = arith.constant 128 : index
    %34 = vector.load %arg10[%c0_35, %c128_36] : memref<16x896xf32, #tpu.memory_space<vmem>>, vector<8x640xf32>
    tpu.vector_store %arg10[%c0_35, %c128_36], %33 {strides = array<i32>} : memref<16x896xf32, #tpu.memory_space<vmem>>, vector<8x640xf32>,
    %c0_37 = arith.constant 0 : index
    %c95_38 = arith.constant 95 : index
    %35 = vector.load %arg10[%c0_37, %c95_38] : memref<16x896xf32, #tpu.memory_space<vmem>>, vector<8x640xf32>
    %c0_39 = arith.constant 0 : index
    %c0_40 = arith.constant 0 : index
    %36 = vector.load %arg11[%c0_39, %c0_40] : memref<144x640xf32, #tpu.memory_space<vmem>>, vector<8x640xf32>
    tpu.vector_store %arg11[%c0_39, %c0_40], %35 {strides = array<i32>} : memref<144x640xf32, #tpu.memory_space<vmem>>, vector<8x640xf32>,
    %c0_41 = arith.constant 0 : index
    %c96_42 = arith.constant 96 : index
    %37 = vector.load %arg10[%c0_41, %c96_42] : memref<16x896xf32, #tpu.memory_space<vmem>>, vector<8x640xf32>
    %c8_43 = arith.constant 8 : index
    %c0_44 = arith.constant 0 : index
    %38 = vector.load %arg11[%c8_43, %c0_44] : memref<144x640xf32, #tpu.memory_space<vmem>>, vector<8x640xf32>
    tpu.vector_store %arg11[%c8_43, %c0_44], %37 {strides = array<i32>} : memref<144x640xf32, #tpu.memory_space<vmem>>, vector<8x640xf32>,
    %c0_45 = arith.constant 0 : index
    %c97_46 = arith.constant 97 : index
    %39 = vector.load %arg10[%c0_45, %c97_46] : memref<16x896xf32, #tpu.memory_space<vmem>>, vector<8x640xf32>
    %c16_47 = arith.constant 16 : index
    %c0_48 = arith.constant 0 : index
    %40 = vector.load %arg11[%c16_47, %c0_48] : memref<144x640xf32, #tpu.memory_space<vmem>>, vector<8x640xf32>
    tpu.vector_store %arg11[%c16_47, %c0_48], %39 {strides = array<i32>} : memref<144x640xf32, #tpu.memory_space<vmem>>, vector<8x640xf32>,
    %c0_49 = arith.constant 0 : index
    %c127_50 = arith.constant 127 : index
    %41 = vector.load %arg10[%c0_49, %c127_50] : memref<16x896xf32, #tpu.memory_space<vmem>>, vector<8x640xf32>
    %c24_51 = arith.constant 24 : index
    %c0_52 = arith.constant 0 : index
    %42 = vector.load %arg11[%c24_51, %c0_52] : memref<144x640xf32, #tpu.memory_space<vmem>>, vector<8x640xf32>
    tpu.vector_store %arg11[%c24_51, %c0_52], %41 {strides = array<i32>} : memref<144x640xf32, #tpu.memory_space<vmem>>, vector<8x640xf32>,
    %c0_53 = arith.constant 0 : index
    %c128_54 = arith.constant 128 : index
    %43 = vector.load %arg10[%c0_53, %c128_54] : memref<16x896xf32, #tpu.memory_space<vmem>>, vector<8x640xf32>
    %c32_55 = arith.constant 32 : index
    %c0_56 = arith.constant 0 : index
    %44 = vector.load %arg11[%c32_55, %c0_56] : memref<144x640xf32, #tpu.memory_space<vmem>>, vector<8x640xf32>
    tpu.vector_store %arg11[%c32_55, %c0_56], %43 {strides = array<i32>} : memref<144x640xf32, #tpu.memory_space<vmem>>, vector<8x640xf32>,
    %c0_57 = arith.constant 0 : index
    %c129_58 = arith.constant 129 : index
    %45 = vector.load %arg10[%c0_57, %c129_58] : memref<16x896xf32, #tpu.memory_space<vmem>>, vector<8x640xf32>
    %c40_59 = arith.constant 40 : index
    %c0_60 = arith.constant 0 : index
    %46 = vector.load %arg11[%c40_59, %c0_60] : memref<144x640xf32, #tpu.memory_space<vmem>>, vector<8x640xf32>
    tpu.vector_store %arg11[%c40_59, %c0_60], %45 {strides = array<i32>} : memref<144x640xf32, #tpu.memory_space<vmem>>, vector<8x640xf32>,
    %c0_61 = arith.constant 0 : index
    %c159_62 = arith.constant 159 : index
    %47 = vector.load %arg10[%c0_61, %c159_62] : memref<16x896xf32, #tpu.memory_space<vmem>>, vector<8x640xf32>
    %c48_63 = arith.constant 48 : index
    %c0_64 = arith.constant 0 : index
    %48 = vector.load %arg11[%c48_63, %c0_64] : memref<144x640xf32, #tpu.memory_space<vmem>>, vector<8x640xf32>
    tpu.vector_store %arg11[%c48_63, %c0_64], %47 {strides = array<i32>} : memref<144x640xf32, #tpu.memory_space<vmem>>, vector<8x640xf32>,
    %c0_65 = arith.constant 0 : index
    %c160_66 = arith.constant 160 : index
    %49 = vector.load %arg10[%c0_65, %c160_66] : memref<16x896xf32, #tpu.memory_space<vmem>>, vector<8x640xf32>
    %c56_67 = arith.constant 56 : index
    %c0_68 = arith.constant 0 : index
    %50 = vector.load %arg11[%c56_67, %c0_68] : memref<144x640xf32, #tpu.memory_space<vmem>>, vector<8x640xf32>
    tpu.vector_store %arg11[%c56_67, %c0_68], %49 {strides = array<i32>} : memref<144x640xf32, #tpu.memory_space<vmem>>, vector<8x640xf32>,
    %c0_69 = arith.constant 0 : index
    %c161_70 = arith.constant 161 : index
    %51 = vector.load %arg10[%c0_69, %c161_70] : memref<16x896xf32, #tpu.memory_space<vmem>>, vector<8x640xf32>
    %c64_71 = arith.constant 64 : index
    %c0_72 = arith.constant 0 : index
    %52 = vector.load %arg11[%c64_71, %c0_72] : memref<144x640xf32, #tpu.memory_space<vmem>>, vector<8x640xf32>
    tpu.vector_store %arg11[%c64_71, %c0_72], %51 {strides = array<i32>} : memref<144x640xf32, #tpu.memory_space<vmem>>, vector<8x640xf32>,
    %c0_73 = arith.constant 0 : index
    %c0_74 = arith.constant 0 : index
    %53 = vector.load %arg11[%c0_73, %c0_74] : memref<144x640xf32, #tpu.memory_space<vmem>>, vector<72x640xf32>
    %c0_75 = arith.constant 0 : index
    %c0_76 = arith.constant 0 : index
    %54 = vector.load %arg5[%c0_75, %c0_76] : memref<16x72xf32, #tpu.memory_space<vmem>>, vector<16x72xf32>
    %cst_77 = arith.constant dense<0.000000e+00> : vector<16x640xf32>
    %55 = tpu.matmul %54, %53, %cst_77 {dimension_numbers = #tpu.dot_dimension_numbers<[1], [0], [0], [1], [0, 0, 1, 1], [], []>} : vector<16x72xf32>, vector<72x640xf32>, vector<16x640xf32> -> vector<16x640xf32>
    %c0_78 = arith.constant 0 : index
    %c0_79 = arith.constant 0 : index
    %56 = vector.load %arg6[%c0_78, %c0_79] : memref<16x1xf32, #tpu.memory_space<vmem>>, vector<16x1xf32>
    %57 = vector.broadcast %56 : vector<16x1xf32> to vector<16x640xf32>
    %58 = arith.addf %55, %57 : vector<16x640xf32>
    %cst_80 = arith.constant 0.000000e+00 : f32
    %59 = vector.broadcast %cst_80 : f32 to vector<16x640xf32>
    %60 = arith.maximumf %58, %59 : vector<16x640xf32>
    %61 = vector.broadcast %0 : vector<1x640xf32> to vector<16x640xf32>
    %62 = arith.mulf %60, %61 : vector<16x640xf32>
    %c0_81 = arith.constant 0 : index
    %c128_82 = arith.constant 128 : index
    %63 = vector.load %arg10[%c0_81, %c128_82] : memref<16x896xf32, #tpu.memory_space<vmem>>, vector<16x640xf32>
    tpu.vector_store %arg10[%c0_81, %c128_82], %62 {strides = array<i32>} : memref<16x896xf32, #tpu.memory_space<vmem>>, vector<16x640xf32>,
    %c0_83 = arith.constant 0 : index
    %c95_84 = arith.constant 95 : index
    %64 = vector.load %arg10[%c0_83, %c95_84] : memref<16x896xf32, #tpu.memory_space<vmem>>, vector<16x640xf32>
    %c0_85 = arith.constant 0 : index
    %c0_86 = arith.constant 0 : index
    %65 = vector.load %arg11[%c0_85, %c0_86] : memref<144x640xf32, #tpu.memory_space<vmem>>, vector<16x640xf32>
    tpu.vector_store %arg11[%c0_85, %c0_86], %64 {strides = array<i32>} : memref<144x640xf32, #tpu.memory_space<vmem>>, vector<16x640xf32>,
    %c0_87 = arith.constant 0 : index
    %c96_88 = arith.constant 96 : index
    %66 = vector.load %arg10[%c0_87, %c96_88] : memref<16x896xf32, #tpu.memory_space<vmem>>, vector<16x640xf32>
    %c16_89 = arith.constant 16 : index
    %c0_90 = arith.constant 0 : index
    %67 = vector.load %arg11[%c16_89, %c0_90] : memref<144x640xf32, #tpu.memory_space<vmem>>, vector<16x640xf32>
    tpu.vector_store %arg11[%c16_89, %c0_90], %66 {strides = array<i32>} : memref<144x640xf32, #tpu.memory_space<vmem>>, vector<16x640xf32>,
    %c0_91 = arith.constant 0 : index
    %c97_92 = arith.constant 97 : index
    %68 = vector.load %arg10[%c0_91, %c97_92] : memref<16x896xf32, #tpu.memory_space<vmem>>, vector<16x640xf32>
    %c32_93 = arith.constant 32 : index
    %c0_94 = arith.constant 0 : index
    %69 = vector.load %arg11[%c32_93, %c0_94] : memref<144x640xf32, #tpu.memory_space<vmem>>, vector<16x640xf32>
    tpu.vector_store %arg11[%c32_93, %c0_94], %68 {strides = array<i32>} : memref<144x640xf32, #tpu.memory_space<vmem>>, vector<16x640xf32>,
    %c0_95 = arith.constant 0 : index
    %c127_96 = arith.constant 127 : index
    %70 = vector.load %arg10[%c0_95, %c127_96] : memref<16x896xf32, #tpu.memory_space<vmem>>, vector<16x640xf32>
    %c48_97 = arith.constant 48 : index
    %c0_98 = arith.constant 0 : index
    %71 = vector.load %arg11[%c48_97, %c0_98] : memref<144x640xf32, #tpu.memory_space<vmem>>, vector<16x640xf32>
    tpu.vector_store %arg11[%c48_97, %c0_98], %70 {strides = array<i32>} : memref<144x640xf32, #tpu.memory_space<vmem>>, vector<16x640xf32>,
    %c0_99 = arith.constant 0 : index
    %c128_100 = arith.constant 128 : index
    %72 = vector.load %arg10[%c0_99, %c128_100] : memref<16x896xf32, #tpu.memory_space<vmem>>, vector<16x640xf32>
    %c64_101 = arith.constant 64 : index
    %c0_102 = arith.constant 0 : index
    %73 = vector.load %arg11[%c64_101, %c0_102] : memref<144x640xf32, #tpu.memory_space<vmem>>, vector<16x640xf32>
    tpu.vector_store %arg11[%c64_101, %c0_102], %72 {strides = array<i32>} : memref<144x640xf32, #tpu.memory_space<vmem>>, vector<16x640xf32>,
    %c0_103 = arith.constant 0 : index
    %c129_104 = arith.constant 129 : index
    %74 = vector.load %arg10[%c0_103, %c129_104] : memref<16x896xf32, #tpu.memory_space<vmem>>, vector<16x640xf32>
    %c80 = arith.constant 80 : index
    %c0_105 = arith.constant 0 : index
    %75 = vector.load %arg11[%c80, %c0_105] : memref<144x640xf32, #tpu.memory_space<vmem>>, vector<16x640xf32>
    tpu.vector_store %arg11[%c80, %c0_105], %74 {strides = array<i32>} : memref<144x640xf32, #tpu.memory_space<vmem>>, vector<16x640xf32>,
    %c0_106 = arith.constant 0 : index
    %c159_107 = arith.constant 159 : index
    %76 = vector.load %arg10[%c0_106, %c159_107] : memref<16x896xf32, #tpu.memory_space<vmem>>, vector<16x640xf32>
    %c96_108 = arith.constant 96 : index
    %c0_109 = arith.constant 0 : index
    %77 = vector.load %arg11[%c96_108, %c0_109] : memref<144x640xf32, #tpu.memory_space<vmem>>, vector<16x640xf32>
    tpu.vector_store %arg11[%c96_108, %c0_109], %76 {strides = array<i32>} : memref<144x640xf32, #tpu.memory_space<vmem>>, vector<16x640xf32>,
    %c0_110 = arith.constant 0 : index
    %c160_111 = arith.constant 160 : index
    %78 = vector.load %arg10[%c0_110, %c160_111] : memref<16x896xf32, #tpu.memory_space<vmem>>, vector<16x640xf32>
    %c112 = arith.constant 112 : index
    %c0_112 = arith.constant 0 : index
    %79 = vector.load %arg11[%c112, %c0_112] : memref<144x640xf32, #tpu.memory_space<vmem>>, vector<16x640xf32>
    tpu.vector_store %arg11[%c112, %c0_112], %78 {strides = array<i32>} : memref<144x640xf32, #tpu.memory_space<vmem>>, vector<16x640xf32>,
    %c0_113 = arith.constant 0 : index
    %c161_114 = arith.constant 161 : index
    %80 = vector.load %arg10[%c0_113, %c161_114] : memref<16x896xf32, #tpu.memory_space<vmem>>, vector<16x640xf32>
    %c128_115 = arith.constant 128 : index
    %c0_116 = arith.constant 0 : index
    %81 = vector.load %arg11[%c128_115, %c0_116] : memref<144x640xf32, #tpu.memory_space<vmem>>, vector<16x640xf32>
    tpu.vector_store %arg11[%c128_115, %c0_116], %80 {strides = array<i32>} : memref<144x640xf32, #tpu.memory_space<vmem>>, vector<16x640xf32>,
    %c0_117 = arith.constant 0 : index
    %c0_118 = arith.constant 0 : index
    %82 = vector.load %arg11[%c0_117, %c0_118] : memref<144x640xf32, #tpu.memory_space<vmem>>, vector<144x640xf32>
    %c0_119 = arith.constant 0 : index
    %c0_120 = arith.constant 0 : index
    %83 = vector.load %arg7[%c0_119, %c0_120] : memref<3x144xf32, #tpu.memory_space<vmem>>, vector<3x144xf32>
    %cst_121 = arith.constant dense<0.000000e+00> : vector<3x640xf32>
    %84 = tpu.matmul %83, %82, %cst_121 {dimension_numbers = #tpu.dot_dimension_numbers<[1], [0], [0], [1], [0, 0, 1, 1], [], []>} : vector<3x144xf32>, vector<144x640xf32>, vector<3x640xf32> -> vector<3x640xf32>
    %c0_122 = arith.constant 0 : index
    %c0_123 = arith.constant 0 : index
    %85 = vector.load %arg8[%c0_122, %c0_123] : memref<3x1xf32, #tpu.memory_space<vmem>>, vector<3x1xf32>
    %86 = vector.broadcast %85 : vector<3x1xf32> to vector<3x640xf32>
    %87 = arith.addf %84, %86 : vector<3x640xf32>
    %c0_124 = arith.constant 0 : index
    %c0_125 = arith.constant 0 : index
    %c0_126 = arith.constant 0 : index
    %88 = vector.load %arg9[%c0_124, %c0_125, %c0_126] : memref<1x3x640xf32, #tpu.memory_space<vmem>>, vector<1x3x640xf32>
    %89 = vector.shape_cast %88 : vector<1x3x640xf32> to vector<3x640xf32>
    %90 = vector.shape_cast %87 : vector<3x640xf32> to vector<1x3x640xf32>
    tpu.vector_store %arg9[%c0_124, %c0_125, %c0_126], %90 {strides = array<i32>} : memref<1x3x640xf32, #tpu.memory_space<vmem>>, vector<1x3x640xf32>,
    return
  }
  func.func @transform_0(%arg0: i32) -> (i32, i32, i32) {
    %c0_i32 = arith.constant 0 : i32
    %c0_i32_0 = arith.constant 0 : i32
    %c0_i32_1 = arith.constant 0 : i32
    return %arg0, %c0_i32, %c0_i32_0 : i32, i32, i32
  }
  func.func @transform_1(%arg0: i32) -> (i32, i32) {
    %c0_i32 = arith.constant 0 : i32
    %c0_i32_0 = arith.constant 0 : i32
    %c0_i32_1 = arith.constant 0 : i32
    return %c0_i32, %c0_i32_0 : i32, i32
  }
  func.func @transform_2(%arg0: i32) -> (i32, i32) {
    %c0_i32 = arith.constant 0 : i32
    %c0_i32_0 = arith.constant 0 : i32
    %c0_i32_1 = arith.constant 0 : i32
    return %c0_i32, %c0_i32_0 : i32, i32
  }
  func.func @transform_3(%arg0: i32) -> (i32, i32) {
    %c0_i32 = arith.constant 0 : i32
    %c0_i32_0 = arith.constant 0 : i32
    %c0_i32_1 = arith.constant 0 : i32
    return %c0_i32, %c0_i32_0 : i32, i32
  }
  func.func @transform_4(%arg0: i32) -> (i32, i32) {
    %c0_i32 = arith.constant 0 : i32
    %c0_i32_0 = arith.constant 0 : i32
    %c0_i32_1 = arith.constant 0 : i32
    return %c0_i32, %c0_i32_0 : i32, i32
  }
  func.func @transform_5(%arg0: i32) -> (i32, i32) {
    %c0_i32 = arith.constant 0 : i32
    %c0_i32_0 = arith.constant 0 : i32
    %c0_i32_1 = arith.constant 0 : i32
    return %c0_i32, %c0_i32_0 : i32, i32
  }
  func.func @transform_6(%arg0: i32) -> (i32, i32) {
    %c0_i32 = arith.constant 0 : i32
    %c0_i32_0 = arith.constant 0 : i32
    %c0_i32_1 = arith.constant 0 : i32
    return %c0_i32, %c0_i32_0 : i32, i32
  }
  func.func @transform_7(%arg0: i32) -> (i32, i32) {
    %c0_i32 = arith.constant 0 : i32
    %c0_i32_0 = arith.constant 0 : i32
    %c0_i32_1 = arith.constant 0 : i32
    return %c0_i32, %c0_i32_0 : i32, i32
  }
  func.func @transform_8(%arg0: i32) -> (i32, i32, i32) {
    %c0_i32 = arith.constant 0 : i32
    %c0_i32_0 = arith.constant 0 : i32
    %c0_i32_1 = arith.constant 0 : i32
    return %arg0, %c0_i32, %c0_i32_0 : i32, i32, i32
  }
}

</mosaic_0001>

<bundles_post_ra>
// kernel: trigger_generator_forward.1
= control target key start
LH: loop header
LB: loop body
LE: loop exit
PB: predicated region body
PF: predicated region fallthrough
CT: control target
= control target key end

     0   :  { %s2847_s27 = smov 0   ;;  %s3904_s0 = inlined_call_operand.vmem [shape: f32[2,8,640], index: 0, kind: input, shape index: {}]   ;;  %s3905_s1 = inlined_call_operand.vmem [shape: f32[1,640], index: 1, kind: input, shape index: {}]   ;;  %s3906_s2 = inlined_call_operand.vmem [shape: f32[8,72], index: 2, kind: input, shape index: {}]   ;;  %s3907_s3 = inlined_call_operand.vmem [shape: f32[8,1], index: 3, kind: input, shape index: {}]   ;;  %s3908_s4 = inlined_call_operand.vmem [shape: f32[16,72], index: 4, kind: input, shape index: {}]   ;;  %s3909_s5 = inlined_call_operand.vmem [shape: f32[16,1], index: 5, kind: input, shape index: {}]   ;;  %s3910_s6 = inlined_call_operand.vmem [shape: f32[3,144], index: 6, kind: input, shape index: {}]   ;;  %s3911_s7 = inlined_call_operand.vmem [shape: f32[3,1], index: 7, kind: input, shape index: {}]   ;;  %s3912_s8 = inlined_call_operand.vmem [shape: f32[2,3,640], index: 8, kind: output, shape index: {}]  }
   0x1 LB: > { %s2640_s28 = sadd.s32 4294967295, %s2789_s27   ;;  %p2644_p0 = scmp.ge.s32.totalorder %s2789_s27, 1  ;;  %s2789_s27 = sphi %s2847_s27, %s18_s27  }
   0x2   : > { %p262_p1 = scmp.lt.s32.totalorder %s2789_s27, 3 }
   0x4   : > { %p263_p2 = pnand %p2644_p0, %p262_p1 }
   0x6   : > { %266 = sbr.rel (%p263_p2) target bundleno = 1287 (0x507), region = 52 }
   0xb   : > { %p296_p3 = scmp.lt.s32.totalorder %s2640_s28, 1  ;;  %v3913_v0 = vmov 0.0   ;;  %s2792_s11 = smov 95   ;;  %vm2800_vm0 = vmmov 0   ;;  %v2801_v6 = vmov 0   ;;  %v707_v7 = vld [vmem:[%s3907_s3] sm:$0xff] }
   0xc   : > { %781 = vmatprep.mubr.f32.mxu1 %v3913_v0  ;;  %2682 = vmatprep.subr.mxu0 %v3913_v0  ;;  %s2793_s12 = smov 96   ;;  %s2794_s13 = smov 97   ;;  %vm645_vm1 = vcmask 777216   ;;  %vm605_vm2 = vcmask 785408   ;;  %vm565_vm3 = vcmask 793600   ;;  %vm525_vm4 = vcmask 1039360  }
   0xd   : > { %s3938_s28 = smov (!%p296_p3, %s2640_s28), 1  ;;  %s2795_s14 = smov 127   ;;  %2700 = vmatprep.mubr.msk.f32.mxu0 %vm2800_vm0, %v3913_v0  ;;  %2745 = vset.pattern.permute.xlu0 %v2801_v6  ;;  %vm475_vm5 = vcmask 7168   ;;  %vm435_vm6 = vcmask 252928   ;;  %vm395_vm7 = vcmask 261120   ;;  %vm355_vm8 = vcmask 269312  }
   0xe   : > { %s2724_s29 = smul.u32 40, %s3938_s28  ;;  %s2796_s15 = smov 1   ;;  %2746 = vset.pattern.permute.xlu1 %v2801_v6  ;;  %v3031_v48 = vld [vmem:[%s3906_s2] sm:$0xff]  ;;  %vm713_vm9 = vcmask 588800   ;;  %vm2359_vm10 = vcmask 130048  }
   0xf   : > { %s2797_s16 = smov 31   ;;  %s2798_s17 = smov 32  }
  0x10   : > { %s2863_s10 = scalar_lea.vmem %s3904_s0, %s2724_s29  ;;  %s2799_s18 = smov 33  }
  0x11   : > { %v2866_v1 = vld [vmem:[%s2863_s10 + $0x8] sm:$0xff]  ;;  %v2869_v2 = vld [vmem:[%s2863_s10] sm:$0xff]  ;;  %v2876_v3 = vld [vmem:[%s2863_s10 + $0x10] sm:$0xff] }
  0x12   : > { %635 = vrot.lane.b32.xlu0 %v2866_v1, %s2792_s11  ;;  %633 = vrot.lane.b32.xlu1 %v2869_v2, %s2792_s11  ;;  %v2923_v4 = vld [vmem:[%s2863_s10 + $0x18] sm:$0xff]  ;;  %v2926_v5 = vld [vmem:[%s2863_s10 + $0x20] sm:$0xff] }
  0x16   : > { %637 = vrot.lane.b32.xlu0 %v2876_v3, %s2792_s11  ;;  %595 = vrot.lane.b32.xlu1 %v2866_v1, %s2793_s12 }
  0x1a   : > { %597 = vrot.lane.b32.xlu0 %v2876_v3, %s2793_s12  ;;  %593 = vrot.lane.b32.xlu1 %v2869_v2, %s2793_s12 }
  0x1e   : > { %555 = vrot.lane.b32.xlu0 %v2866_v1, %s2794_s13  ;;  %557 = vrot.lane.b32.xlu1 %v2876_v3, %s2794_s13 }
  0x22   : > { %553 = vrot.lane.b32.xlu0 %v2869_v2, %s2794_s13  ;;  %515 = vrot.lane.b32.xlu1 %v2866_v1, %s2795_s14 }
  0x26   : > { %517 = vrot.lane.b32.xlu0 %v2876_v3, %s2795_s14  ;;  %513 = vrot.lane.b32.xlu1 %v2869_v2, %s2795_s14 }
  0x2a   : > { %465 = vrot.lane.b32.xlu0 %v2869_v2, %s2796_s15  ;;  %467 = vrot.lane.b32.xlu1 %v2866_v1, %s2796_s15 }
  0x2e   : > { %463 = vrot.lane.b32.xlu0 %v3913_v0, %s2796_s15  ;;  %425 = vrot.lane.b32.xlu1 %v2869_v2, %s2797_s16 }
  0x32   : > { %427 = vrot.lane.b32.xlu0 %v2866_v1, %s2797_s16  ;;  %423 = vrot.lane.b32.xlu1 %v3913_v0, %s2797_s16 }
  0x36   : > { %385 = vrot.lane.b32.xlu0 %v2869_v2, %s2798_s17  ;;  %387 = vrot.lane.b32.xlu1 %v2866_v1, %s2798_s17 }
  0x3a   : > { %383 = vrot.lane.b32.xlu0 %v3913_v0, %s2798_s17  ;;  %345 = vrot.lane.b32.xlu1 %v2869_v2, %s2799_s18 }
  0x3e   : > { %347 = vrot.lane.b32.xlu0 %v2866_v1, %s2799_s18  ;;  %343 = vrot.lane.b32.xlu1 %v3913_v0, %s2799_s18 }
  0x42   : > { %639 = vrot.lane.b32.xlu0 %v2923_v4, %s2792_s11  ;;  %641 = vrot.lane.b32.xlu1 %v2926_v5, %s2792_s11 }
  0x46   : > { %599 = vrot.lane.b32.xlu0 %v2923_v4, %s2793_s12  ;;  %601 = vrot.lane.b32.xlu1 %v2926_v5, %s2793_s12 }
  0x4a   : > { %643 = vrot.lane.b32.xlu0 %v3913_v0, %s2792_s11  ;;  %559 = vrot.lane.b32.xlu1 %v2923_v4, %s2794_s13 }
  0x4e   : > { %561 = vrot.lane.b32.xlu0 %v2926_v5, %s2794_s13  ;;  %603 = vrot.lane.b32.xlu1 %v3913_v0, %s2793_s12 }
  0x52   : > { %519 = vrot.lane.b32.xlu0 %v2923_v4, %s2795_s14  ;;  %521 = vrot.lane.b32.xlu1 %v2926_v5, %s2795_s14 }
  0x56   : > { %563 = vrot.lane.b32.xlu0 %v3913_v0, %s2794_s13  ;;  %523 = vrot.lane.b32.xlu1 %v3913_v0, %s2795_s14 }
  0x5a   : > { %469 = vrot.lane.b32.xlu0 %v2876_v3, %s2796_s15  ;;  %471 = vrot.lane.b32.xlu1 %v2923_v4, %s2796_s15 }
  0x5e   : > { %429 = vrot.lane.b32.xlu0 %v2876_v3, %s2797_s16  ;;  %431 = vrot.lane.b32.xlu1 %v2923_v4, %s2797_s16 }
  0x62   : > { %473 = vrot.lane.b32.xlu0 %v2926_v5, %s2796_s15  ;;  %389 = vrot.lane.b32.xlu1 %v2876_v3, %s2798_s17 }
  0x66   : > { %391 = vrot.lane.b32.xlu0 %v2923_v4, %s2798_s17  ;;  %433 = vrot.lane.b32.xlu1 %v2926_v5, %s2797_s16 }
  0x6a   : > { %349 = vrot.lane.b32.xlu0 %v2876_v3, %s2799_s18  ;;  %351 = vrot.lane.b32.xlu1 %v2923_v4, %s2799_s18 }
  0x6e   : > { %393 = vrot.lane.b32.xlu0 %v2926_v5, %s2798_s17  ;;  %353 = vrot.lane.b32.xlu1 %v2926_v5, %s2799_s18 }
  0x72   : > { %710 = vperm.xlu0 %2745, %v707_v7   ;;  %1060 = vrot.lane.b32.xlu1 %v3913_v0, %s2797_s16 }
  0x76   : > { %1099 = vrot.lane.b32.xlu0 %v3913_v0, %s2796_s15 }
  0x7a   : > { %1021 = vrot.lane.b32.xlu0 %v3913_v0, %s2798_s17 }
  0x84   : > { %v636_v8 = vpop.permute.xlu0 %635  ;;  %v634_v9 = vpop.permute.xlu1 %633 }
  0x85   : > { %v646_v13 = vsel %vm645_vm1, %v634_v9, %v636_v8 }
  0x88   : > { %v2986_v10 = vpop.permute.xlu0 %637  ;;  %v596_v11 = vpop.permute.xlu1 %595 }
  0x89   : > { %v647_v12 = vsel %vm645_vm1, %v636_v8, %v2986_v10 }
  0x8a   : > { %731 = vmatprep.subr.mxu1 %v647_v12 }
  0x8b   : > { %732 = vmatpush1.msra.mxu1 %v646_v13 }
  0x8c   : > { %v2991_v14 = vpop.permute.xlu0 %597  ;;  %v594_v15 = vpop.permute.xlu1 %593 }
  0x8d   : > { %v607_v16 = vsel %vm605_vm2, %v596_v11, %v2991_v14  ;;  %v606_v17 = vsel %vm605_vm2, %v594_v15, %v596_v11 }
  0x8e   : > { %733 = vmatprep.subr.mxu1 %v607_v16 }
  0x8f   : > { %734 = vmatpush1.msra.mxu1 %v606_v17 }
  0x90   : > { %v556_v18 = vpop.permute.xlu0 %555  ;;  %v2996_v19 = vpop.permute.xlu1 %557 }
  0x91   : > { %v567_v20 = vsel %vm565_vm3, %v556_v18, %v2996_v19 }
  0x92   : > { %735 = vmatprep.subr.mxu1 %v567_v20 }
  0x94   : > { %v554_v21 = vpop.permute.xlu0 %553  ;;  %v516_v22 = vpop.permute.xlu1 %515 }
  0x95   : > { %v566_v23 = vsel %vm565_vm3, %v554_v21, %v556_v18 }
  0x96   : > { %736 = vmatpush1.msra.mxu1 %v566_v23 }
  0x98   : > { %v3001_v24 = vpop.permute.xlu0 %517  ;;  %v514_v25 = vpop.permute.xlu1 %513 }
  0x99   : > { %v527_v26 = vsel %vm525_vm4, %v516_v22, %v3001_v24  ;;  %v526_v27 = vsel %vm525_vm4, %v514_v25, %v516_v22 }
  0x9a   : > { %737 = vmatprep.subr.mxu1 %v527_v26 }
  0x9b   : > { %738 = vmatpush1.msra.mxu1 %v526_v27 }
  0x9c   : > { %v466_v28 = vpop.permute.xlu0 %465  ;;  %739 = vmatprep.subr.mxu1 %v2866_v1  ;;  %v3007_v29 = vpop.permute.xlu1 %467 }
  0x9d   : > { %740 = vmatpush1.msra.mxu1 %v2869_v2  ;;  %v477_v30 = vsel %vm475_vm5, %v466_v28, %v3007_v29 }
  0x9e   : > { %741 = vmatprep.subr.mxu1 %v477_v30 }
  0xa0   : > { %v464_v31 = vpop.permute.xlu0 %463  ;;  %v426_v32 = vpop.permute.xlu1 %425 }
  0xa1   : > { %v476_v33 = vsel %vm475_vm5, %v464_v31, %v466_v28 }
  0xa2   : > { %742 = vmatpush1.msra.mxu1 %v476_v33 }
  0xa4   : > { %v3013_v34 = vpop.permute.xlu0 %427  ;;  %v424_v35 = vpop.permute.xlu1 %423 }
  0xa5   : > { %v437_v36 = vsel %vm435_vm6, %v426_v32, %v3013_v34  ;;  %v436_v37 = vsel %vm435_vm6, %v424_v35, %v426_v32 }
  0xa6   : > { %743 = vmatprep.subr.mxu1 %v437_v36 }
  0xa7   : > { %744 = vmatpush1.msra.mxu1 %v436_v37 }
  0xa8   : > { %v386_v38 = vpop.permute.xlu0 %385  ;;  %v3018_v39 = vpop.permute.xlu1 %387 }
  0xa9   : > { %v397_v40 = vsel %vm395_vm7, %v386_v38, %v3018_v39 }
  0xaa   : > { %745 = vmatprep.subr.mxu1 %v397_v40 }
  0xac   : > { %v384_v41 = vpop.permute.xlu0 %383  ;;  %v346_v42 = vpop.permute.xlu1 %345 }
  0xad   : > { %v396_v43 = vsel %vm395_vm7, %v384_v41, %v386_v38  ;;  %v306_v38 = vld [vmem:[%s3905_s1] sm:$0x1f] }
  0xae   : > { %746 = vmatpush1.msra.mxu1 %v396_v43 }
  0xb0   : > { %v3023_v44 = vpop.permute.xlu0 %347  ;;  %v344_v45 = vpop.permute.xlu1 %343 }
  0xb1   : > { %v357_v46 = vsel %vm355_vm8, %v346_v42, %v3023_v44  ;;  %v356_v47 = vsel %vm355_vm8, %v344_v45, %v346_v42 }
  0xb2   : > { %747 = vmatprep.subr.mxu1 %v357_v46 }
  0xb3   : > { %748 = vmatpush1.msra.mxu1 %v356_v47 }
  0xb4   : > { %v640_v49 = vpop.permute.xlu0 %639  ;;  %v642_v50 = vpop.permute.xlu1 %641  ;;  %2647 = vmatmul.mubr.msk.f32.vlgmr.msra.gmra.mxu1 %vm713_vm9, %v3031_v48 }
  0xb5   : > { %v649_v51 = vsel %vm645_vm1, %v640_v49, %v642_v50  ;;  %v648_v52 = vsel %vm645_vm1, %v2986_v10, %v640_v49  ;;  %852 = vmatprep.mubr.f32.mxu1 %v3913_v0 }
  0xb6   : > { %802 = vmatprep.subr.mxu1 %v649_v51 }
  0xb7   : > { %803 = vmatpush1.msra.mxu1 %v648_v52 }
  0xb8   : > { %v600_v53 = vpop.permute.xlu0 %599  ;;  %v602_v54 = vpop.permute.xlu1 %601 }
  0xb9   : > { %v609_v55 = vsel %vm605_vm2, %v600_v53, %v602_v54  ;;  %v608_v56 = vsel %vm605_vm2, %v2991_v14, %v600_v53 }
  0xba   : > { %804 = vmatprep.subr.mxu1 %v609_v55 }
  0xbb   : > { %805 = vmatpush1.msra.mxu1 %v608_v56 }
  0xbc   : > { %v644_v57 = vpop.permute.xlu0 %643  ;;  %v560_v58 = vpop.permute.xlu1 %559 }
  0xbd   : > { %v650_v59 = vsel %vm645_vm1, %v642_v50, %v644_v57  ;;  %v568_v1 = vsel %vm565_vm3, %v2996_v19, %v560_v58 }
  0xbe   : > { %2683 = vmatpush3.msra.mxu0 %v650_v59 }
  0xbf   : > { %2684 = vmatprep.subr.mxu0 %v3913_v0 }
  0xc0   : > { %v562_v60 = vpop.permute.xlu0 %561  ;;  %v604_v61 = vpop.permute.xlu1 %603 }
  0xc1   : > { %v569_v62 = vsel %vm565_vm3, %v560_v58, %v562_v60  ;;  %v610_v63 = vsel %vm605_vm2, %v602_v54, %v604_v61 }
  0xc2   : > { %806 = vmatprep.subr.mxu1 %v569_v62  ;;  %2685 = vmatpush3.msra.mxu0 %v610_v63 }
  0xc3   : > { %807 = vmatpush1.msra.mxu1 %v568_v1  ;;  %2686 = vmatprep.subr.mxu0 %v3913_v0 }
  0xc4   : > { %v520_v2 = vpop.permute.xlu0 %519  ;;  %v522_v6 = vpop.permute.xlu1 %521 }
  0xc5   : > { %v529_v7 = vsel %vm525_vm4, %v520_v2, %v522_v6  ;;  %v528_v8 = vsel %vm525_vm4, %v3001_v24, %v520_v2 }
  0xc6   : > { %808 = vmatprep.subr.mxu1 %v529_v7 }
  0xc7   : > { %809 = vmatpush1.msra.mxu1 %v528_v8 }
  0xc8   : > { %v564_v9 = vpop.permute.xlu0 %563  ;;  %v524_v10 = vpop.permute.xlu1 %523  ;;  %810 = vmatprep.subr.mxu1 %v2923_v4 }
  0xc9   : > { %v570_v11 = vsel %vm565_vm3, %v562_v60, %v564_v9  ;;  %811 = vmatpush1.msra.mxu1 %v2876_v3  ;;  %v530_v12 = vsel %vm525_vm4, %v522_v6, %v524_v10  ;;  %v1340_v9 = vld [vmem:[%s3909_s5 + $0x8] sm:$0xff]  ;;  %v1339_v10 = vld [vmem:[%s3909_s5] sm:$0xff] }
  0xca   : > { %2687 = vmatpush3.msra.mxu0 %v570_v11 }
  0xcb   : > { %2688 = vmatprep.subr.mxu0 %v3913_v0 }
  0xcc   : > { %v470_v13 = vpop.permute.xlu0 %469  ;;  %2689 = vmatpush3.msra.mxu0 %v530_v12  ;;  %v472_v14 = vpop.permute.xlu1 %471 }
  0xcd   : > { %v479_v15 = vsel %vm475_vm5, %v470_v13, %v472_v14  ;;  %v478_v16 = vsel %vm475_vm5, %v3007_v29, %v470_v13  ;;  %2690 = vmatprep.subr.mxu0 %v3913_v0 }
  0xce   : > { %812 = vmatprep.subr.mxu1 %v479_v15  ;;  %2691 = vmatpush3.msra.mxu0 %v2926_v5 }
  0xcf   : > { %813 = vmatpush1.msra.mxu1 %v478_v16  ;;  %2692 = vmatprep.subr.mxu0 %v3913_v0 }
  0xd0   : > { %v430_v3 = vpop.permute.xlu0 %429  ;;  %v432_v4 = vpop.permute.xlu1 %431 }
  0xd1   : > { %v439_v17 = vsel %vm435_vm6, %v430_v3, %v432_v4  ;;  %v438_v18 = vsel %vm435_vm6, %v3013_v34, %v430_v3  ;;  %v935_v34 = vlaneseq }
  0xd2   : > { %814 = vmatprep.subr.mxu1 %v439_v17 }
  0xd3   : > { %815 = vmatpush1.msra.mxu1 %v438_v18  ;;  %v936_v35 = vshrl.u32 %v935_v34, 7 }
  0xd4   : > { %v474_v19 = vpop.permute.xlu0 %473  ;;  %v390_v20 = vpop.permute.xlu1 %389 }
  0xd5   : > { %v480_v21 = vsel %vm475_vm5, %v472_v14, %v474_v19  ;;  %v398_v25 = vsel %vm395_vm7, %v3018_v39, %v390_v20  ;;  %v953_v36 = vsub.s32 4, %v936_v35  ;;  %v937_v46 = vsub.s32 0, %v936_v35 }
  0xd6   : > { %2693 = vmatpush3.msra.mxu0 %v480_v21  ;;  %v941_v53 = vsub.s32 1, %v936_v35  ;;  %v945_v59 = vsub.s32 2, %v936_v35  ;;  %v949_v2 = vsub.s32 3, %v936_v35 }
  0xd7   : > { %2694 = vmatprep.subr.mxu0 %v3913_v0  ;;  %v3088_v41 = vrot.slane %v306_v38, %v953_v36  ;;  %v3097_v49 = vrot.slane %v306_v38, %v937_v46 }
  0xd8   : > { %v392_v5 = vpop.permute.xlu0 %391  ;;  %v434_v22 = vpop.permute.xlu1 %433  ;;  %v3118_v55 = vrot.slane %v306_v38, %v941_v53  ;;  %v3135_v61 = vrot.slane %v306_v38, %v945_v59  ;;  %v3152_v7 = vrot.slane %v306_v38, %v949_v2 }
  0xd9   : > { %v399_v23 = vsel %vm395_vm7, %v390_v20, %v392_v5  ;;  %v440_v24 = vsel %vm435_vm6, %v432_v4, %v434_v22 }
  0xda   : > { %816 = vmatprep.subr.mxu1 %v399_v23  ;;  %2695 = vmatpush3.msra.mxu0 %v440_v24 }
  0xdb   : > { %817 = vmatpush1.msra.mxu1 %v398_v25  ;;  %2696 = vmatprep.subr.mxu0 %v3913_v0 }
  0xdc   : > { %v350_v26 = vpop.permute.xlu0 %349  ;;  %v352_v27 = vpop.permute.xlu1 %351 }
  0xdd   : > { %v359_v28 = vsel %vm355_vm8, %v350_v26, %v352_v27  ;;  %v358_v29 = vsel %vm355_vm8, %v3023_v44, %v350_v26 }
  0xde   : > { %818 = vmatprep.subr.mxu1 %v359_v28 }
  0xdf   : > { %819 = vmatpush1.msra.mxu1 %v358_v29 }
  0xe0   : > { %v394_v30 = vpop.permute.xlu0 %393  ;;  %v354_v31 = vpop.permute.xlu1 %353  ;;  %2648 = vmatmul.mubr.msk.f32.vlgmr.msra.gmra.mxu1 %vm713_vm9, %v3031_v48 }
  0xe1   : > { %v400_v32 = vsel %vm395_vm7, %v392_v5, %v394_v30  ;;  %1421 = vmatprep.mubr.f32.mxu1 %v3913_v0  ;;  %v360_v33 = vsel %vm355_vm8, %v352_v27, %v354_v31 }
  0xe2   : > { %2697 = vmatpush3.msra.mxu0 %v400_v32 }
  0xe3   : > { %2698 = vmatprep.subr.mxu0 %v3913_v0 }
  0xe4   : > { %2699 = vmatpush3.msra.mxu0 %v360_v33  ;;  %v1061_v13 = vpop.permute.xlu1 %1060 }
  0xe5   : > { %2701 = vmatmul.mubr.msk.f32.vlgmr.msra.gmra.mxu0 %vm713_vm9, %v3031_v48 }
  0xe6   : > { %1498 = vmatprep.mubr.f32.mxu0 %v3913_v0 }
  0xed   : > { %v711_v37 = vpop.permute.xlu0 %710 }
  0xf1   : > { %v1100_v11 = vpop.permute.xlu0 %1099 }
  0xf5   : > { %v3219_v12 = vpop.permute.xlu0 %1021 }
 0x174   : > { %v783_v44 = vpop.f32.mrf.mxu1 }
 0x175   : > { %v784_v45 = vadd.f32 %v783_v44, %v711_v37 }
 0x176   : > { %v785_v51 = vpop.f32.mrf.mxu1 }
 0x177   : > { %v929_v48 = vmax.f32 %v784_v45, 0.0  ;;  %v786_v52 = vadd.f32 %v785_v51, %v711_v37 }
 0x179   : > { %v3104_v50 = vmul.f32 %v3097_v49, %v929_v48  ;;  %v930_v54 = vmax.f32 %v786_v52, 0.0 }
 0x17b   : > { %v3125_v56 = vmul.f32 %v3118_v55, %v930_v54 }
 0x1a0   : > { %v854_v57 = vpop.f32.mrf.mxu1 }
 0x1a1   : > { %v855_v58 = vadd.f32 %v854_v57, %v711_v37 }
 0x1a2   : > { %v856_v63 = vpop.f32.mrf.mxu1 }
 0x1a3   : > { %v931_v60 = vmax.f32 %v855_v58, 0.0  ;;  %v857_v1 = vadd.f32 %v856_v63, %v711_v37 }
 0x1a5   : > { %v925_v39 = vpop.f32.mrf.mxu0  ;;  %v3142_v62 = vmul.f32 %v3135_v61, %v931_v60  ;;  %v932_v6 = vmax.f32 %v857_v1, 0.0 }
 0x1a6   : > { %v926_v40 = vadd.f32 %v925_v39, %v711_v37 }
 0x1a7   : > { %v2702_v42 = vpop.f32.mrf.mxu0  ;;  %v3159_v8 = vmul.f32 %v3152_v7, %v932_v6 }
 0x1a8   : > { %v933_v43 = vmax.f32 %v926_v40, 0.0 }
 0x1aa   : > { %v3091_v47 = vmul.f32 %v3088_v41, %v933_v43 }
 0x1ac   : > { %1234 = vrot.lane.b32.xlu1 %v3091_v47, %s2793_s12  ;;  %1273 = vrot.lane.b32.xlu0 %v3091_v47, %s2792_s11 }
 0x1b0   : > { %1156 = vrot.lane.b32.xlu1 %v3091_v47, %s2795_s14  ;;  %1195 = vrot.lane.b32.xlu0 %v3091_v47, %s2794_s13 }
 0x1b4   : > { %1226 = vrot.lane.b32.xlu1 %v3104_v50, %s2793_s12  ;;  %1265 = vrot.lane.b32.xlu0 %v3104_v50, %s2792_s11 }
 0x1b8   : > { %1148 = vrot.lane.b32.xlu1 %v3104_v50, %s2795_s14  ;;  %1187 = vrot.lane.b32.xlu0 %v3104_v50, %s2794_s13 }
 0x1bc   : > { %1062 = vrot.lane.b32.xlu1 %v3104_v50, %s2797_s16  ;;  %1101 = vrot.lane.b32.xlu0 %v3104_v50, %s2796_s15 }
 0x1c0   : > { %984 = vrot.lane.b32.xlu1 %v3104_v50, %s2799_s18  ;;  %1023 = vrot.lane.b32.xlu0 %v3104_v50, %s2798_s17 }
 0x1c4   : > { %1267 = vrot.lane.b32.xlu1 %v3125_v56, %s2792_s11  ;;  %1189 = vrot.lane.b32.xlu0 %v3125_v56, %s2794_s13 }
 0x1c8   : > { %1228 = vrot.lane.b32.xlu1 %v3125_v56, %s2793_s12  ;;  %1064 = vrot.lane.b32.xlu0 %v3125_v56, %s2797_s16 }
 0x1cc   : > { %1150 = vrot.lane.b32.xlu1 %v3125_v56, %s2795_s14  ;;  %986 = vrot.lane.b32.xlu0 %v3125_v56, %s2799_s18 }
 0x1d0   : > { %1103 = vrot.lane.b32.xlu1 %v3125_v56, %s2796_s15  ;;  %1230 = vrot.lane.b32.xlu0 %v3142_v62, %s2793_s12 }
 0x1d4   : > { %1025 = vrot.lane.b32.xlu1 %v3125_v56, %s2798_s17  ;;  %1152 = vrot.lane.b32.xlu0 %v3142_v62, %s2795_s14 }
 0x1d8   : > { %1269 = vrot.lane.b32.xlu1 %v3142_v62, %s2792_s11  ;;  %1066 = vrot.lane.b32.xlu0 %v3142_v62, %s2797_s16 }
 0x1dc   : > { %1191 = vrot.lane.b32.xlu1 %v3142_v62, %s2794_s13  ;;  %1232 = vrot.lane.b32.xlu0 %v3159_v8, %s2793_s12 }
 0x1e0   : > { %1105 = vrot.lane.b32.xlu1 %v3142_v62, %s2796_s15  ;;  %1154 = vrot.lane.b32.xlu0 %v3159_v8, %s2795_s14 }
 0x1e4   : > { %1027 = vrot.lane.b32.xlu1 %v3142_v62, %s2798_s17  ;;  %1107 = vrot.lane.b32.xlu0 %v3159_v8, %s2796_s15 }
 0x1e8   : > { %1271 = vrot.lane.b32.xlu1 %v3159_v8, %s2792_s11  ;;  %1029 = vrot.lane.b32.xlu0 %v3159_v8, %s2798_s17 }
 0x1ec   : > { %1193 = vrot.lane.b32.xlu1 %v3159_v8, %s2794_s13  ;;  %988 = vrot.lane.b32.xlu0 %v3142_v62, %s2799_s18 }
 0x1f0   : > { %982 = vrot.lane.b32.xlu1 %v3913_v0, %s2799_s18  ;;  %1275 = vrot.lane.b32.xlu0 %v3913_v0, %s2792_s11 }
 0x1f4   : > { %1068 = vrot.lane.b32.xlu1 %v3159_v8, %s2797_s16  ;;  %1197 = vrot.lane.b32.xlu0 %v3913_v0, %s2794_s13 }
 0x1f8   : > { %990 = vrot.lane.b32.xlu1 %v3159_v8, %s2799_s18  ;;  %1109 = vrot.lane.b32.xlu0 %v3091_v47, %s2796_s15 }
 0x1fc   : > { %1236 = vrot.lane.b32.xlu1 %v3913_v0, %s2793_s12  ;;  %1031 = vrot.lane.b32.xlu0 %v3091_v47, %s2798_s17 }
 0x200   : > { %1158 = vrot.lane.b32.xlu1 %v3913_v0, %s2795_s14  ;;  %1348 = vperm.xlu0 %2745, %v1340_v9  }
 0x204   : > { %1070 = vrot.lane.b32.xlu1 %v3091_v47, %s2797_s16  ;;  %2748 = vrot.lane.b32.xlu0 %v3913_v0, %s2796_s15 }
 0x208   : > { %992 = vrot.lane.b32.xlu1 %v3091_v47, %s2799_s18  ;;  %2758 = vrot.lane.b32.xlu0 %v3913_v0, %s2798_s17 }
 0x20c   : > { %1343 = vperm.xlu1 %2746, %v1339_v10   ;;  %2768 = vrot.lane.b32.xlu0 %v3913_v0, %s2793_s12 }
 0x210   : > { %2753 = vrot.lane.b32.xlu1 %v3913_v0, %s2797_s16  ;;  %2778 = vrot.lane.b32.xlu0 %v3913_v0, %s2795_s14 }
 0x214   : > { %2763 = vrot.lane.b32.xlu1 %v3913_v0, %s2799_s18 }
 0x218   : > { %2773 = vrot.lane.b32.xlu1 %v3913_v0, %s2794_s13 }
 0x21e   : > { %v3221_v14 = vpop.permute.xlu0 %1273  ;;  %v3223_v15 = vpop.permute.xlu1 %1234 }
 0x222   : > { %v3225_v16 = vpop.permute.xlu0 %1195  ;;  %v3227_v3 = vpop.permute.xlu1 %1156 }
 0x226   : > { %v1266_v4 = vpop.permute.xlu0 %1265  ;;  %v1227_v17 = vpop.permute.xlu1 %1226 }
 0x22a   : > { %v1188_v18 = vpop.permute.xlu0 %1187  ;;  %v1149_v19 = vpop.permute.xlu1 %1148 }
 0x22e   : > { %v1102_v20 = vpop.permute.xlu0 %1101  ;;  %v1063_v21 = vpop.permute.xlu1 %1062 }
 0x22f   : > { %v1111_v54 = vsel %vm475_vm5, %v1100_v11, %v1102_v20  ;;  %v1072_v58 = vsel %vm435_vm6, %v1061_v13, %v1063_v21 }
 0x232   : > { %v1024_v5 = vpop.permute.xlu0 %1023  ;;  %v3229_v22 = vpop.permute.xlu1 %984 }
 0x233   : > { %v1033_v60 = vsel %vm395_vm7, %v3219_v12, %v1024_v5 }
 0x236   : > { %v1190_v23 = vpop.permute.xlu0 %1189  ;;  %v1268_v24 = vpop.permute.xlu1 %1267 }
 0x237   : > { %v1277_v36 = vsel %vm645_vm1, %v1266_v4, %v1268_v24  ;;  %v1199_v43 = vsel %vm565_vm3, %v1188_v18, %v1190_v23 }
 0x23a   : > { %v3231_v25 = vpop.permute.xlu0 %1064  ;;  %v1229_v26 = vpop.permute.xlu1 %1228 }
 0x23b   : > { %v1238_v40 = vsel %vm605_vm2, %v1227_v17, %v1229_v26  ;;  %v1073_v57 = vsel %vm435_vm6, %v1063_v21, %v3231_v25 }
 0x23e   : > { %v3233_v27 = vpop.permute.xlu0 %986  ;;  %v1151_v28 = vpop.permute.xlu1 %1150 }
 0x23f   : > { %v1160_v48 = vsel %vm525_vm4, %v1149_v19, %v1151_v28  ;;  %v995_v63 = vsel %vm355_vm8, %v3229_v22, %v3233_v27 }
 0x242   : > { %v1231_v29 = vpop.permute.xlu0 %1230  ;;  %v3235_v30 = vpop.permute.xlu1 %1103 }
 0x243   : > { %v1239_v37 = vsel %vm605_vm2, %v1229_v26, %v1231_v29  ;;  %v1112_v51 = vsel %vm475_vm5, %v1102_v20, %v3235_v30  ;;  %v1337_v20 = vld [vmem:[%s3908_s4] sm:$0xff] }
 0x246   : > { %v3237_v31 = vpop.permute.xlu0 %1152  ;;  %v3239_v32 = vpop.permute.xlu1 %1025 }
 0x247   : > { %v1161_v44 = vsel %vm525_vm4, %v1151_v28, %v3237_v31 }
 0x24a   : > { %v3241_v33 = vpop.permute.xlu0 %1066  ;;  %v1270_v34 = vpop.permute.xlu1 %1269 }
 0x24b   : > { %v1278_v35 = vsel %vm645_vm1, %v1268_v24, %v1270_v34 }
 0x24c   : > { %1371 = vmatprep.subr.mxu1 %v1278_v35 }
 0x24d   : > { %1372 = vmatpush1.msra.mxu1 %v1277_v36 }
 0x24e   : > { %v1233_v38 = vpop.permute.xlu0 %1232  ;;  %1373 = vmatprep.subr.mxu1 %v1239_v37  ;;  %v1192_v39 = vpop.permute.xlu1 %1191 }
 0x24f   : > { %1374 = vmatpush1.msra.mxu1 %v1238_v40  ;;  %v1200_v42 = vsel %vm565_vm3, %v1190_v23, %v1192_v39  ;;  %v1241_v6 = vsel %vm605_vm2, %v1233_v38, %v3223_v15  ;;  %v1240_v11 = vsel %vm605_vm2, %v1231_v29, %v1233_v38 }
 0x250   : > { %1375 = vmatprep.subr.mxu1 %v1200_v42 }
 0x251   : > { %1376 = vmatpush1.msra.mxu1 %v1199_v43 }
 0x252   : > { %v1155_v45 = vpop.permute.xlu0 %1154  ;;  %1377 = vmatprep.subr.mxu1 %v1161_v44  ;;  %v1106_v46 = vpop.permute.xlu1 %1105 }
 0x253   : > { %1378 = vmatpush1.msra.mxu1 %v1160_v48  ;;  %v1163_v4 = vsel %vm525_vm4, %v1155_v45, %v3227_v3  ;;  %v1162_v19 = vsel %vm525_vm4, %v3237_v31, %v1155_v45 }
 0x254   : > { %1379 = vmatprep.subr.mxu1 %v3125_v56 }
 0x255   : > { %1380 = vmatpush1.msra.mxu1 %v3104_v50  ;;  %v1034_v50 = vsel %vm395_vm7, %v1024_v5, %v3239_v32 }
 0x256   : > { %v3256_v52 = vpop.permute.xlu0 %1107  ;;  %1381 = vmatprep.subr.mxu1 %v1112_v51  ;;  %v1028_v53 = vpop.permute.xlu1 %1027 }
 0x257   : > { %1382 = vmatpush1.msra.mxu1 %v1111_v54  ;;  %v1114_v23 = vsel %vm475_vm5, %v1106_v46, %v3256_v52  ;;  %v1035_v29 = vsel %vm395_vm7, %v3239_v32, %v1028_v53 }
 0x258   : > { %1383 = vmatprep.subr.mxu1 %v1073_v57 }
 0x259   : > { %1384 = vmatpush1.msra.mxu1 %v1072_v58 }
 0x25a   : > { %v3264_v56 = vpop.permute.xlu0 %1029  ;;  %1385 = vmatprep.subr.mxu1 %v1034_v50  ;;  %v1272_v59 = vpop.permute.xlu1 %1271 }
 0x25b   : > { %1386 = vmatpush1.msra.mxu1 %v1033_v60  ;;  %v1280_v1 = vsel %vm645_vm1, %v1272_v59, %v3221_v14  ;;  %v1279_v2 = vsel %vm645_vm1, %v1270_v34, %v1272_v59  ;;  %v1036_v26 = vsel %vm395_vm7, %v1028_v53, %v3264_v56 }
 0x25c   : > { %1387 = vmatprep.subr.mxu1 %v995_v63  ;;  %1448 = vmatprep.subr.mxu0 %v1280_v1 }
 0x25d   : > { %1449 = vmatpush1.msra.mxu0 %v1279_v2 }
 0x25e   : > { %v989_v9 = vpop.permute.xlu0 %988  ;;  %1450 = vmatprep.subr.mxu0 %v1241_v6  ;;  %v1194_v10 = vpop.permute.xlu1 %1193 }
 0x25f   : > { %1451 = vmatpush1.msra.mxu0 %v1240_v11  ;;  %v1202_v12 = vsel %vm565_vm3, %v1194_v10, %v3225_v16  ;;  %v1201_v13 = vsel %vm565_vm3, %v1192_v39, %v1194_v10 }
 0x260   : > { %1452 = vmatprep.subr.mxu0 %v1202_v12 }
 0x261   : > { %1453 = vmatpush1.msra.mxu0 %v1201_v13 }
 0x262   : > { %v1276_v17 = vpop.permute.xlu0 %1275  ;;  %1454 = vmatprep.subr.mxu0 %v1163_v4  ;;  %v983_v18 = vpop.permute.xlu1 %982 }
 0x263   : > { %v994_v21 = vsel %vm355_vm8, %v983_v18, %v3229_v22  ;;  %1455 = vmatpush1.msra.mxu0 %v1162_v19  ;;  %v1281_v5 = vsel %vm645_vm1, %v3221_v14, %v1276_v17  ;;  %v1113_v22 = vsel %vm475_vm5, %v3235_v30, %v1106_v46  ;;  %v1338_v14 = vld [vmem:[%s3908_s4 + $0x8] sm:$0xff] }
 0x264   : > { %1388 = vmatpush1.msra.mxu1 %v994_v21  ;;  %1456 = vmatprep.subr.mxu0 %v3159_v8 }
 0x265   : > { %2650 = vmatmul.mubr.msk.f32.vlgmr.msra.gmra.mxu1 %vm713_vm9, %v1337_v20  ;;  %1457 = vmatpush1.msra.mxu0 %v3142_v62  ;;  %v1074_v62 = vsel %vm435_vm6, %v3231_v25, %v3241_v33  ;;  %v996_v25 = vsel %vm355_vm8, %v3233_v27, %v989_v9 }
 0x266   : > { %2703 = vmatprep.subr.mxu1 %v1281_v5  ;;  %1458 = vmatprep.subr.mxu0 %v1114_v23  ;;  %v1069_v24 = vpop.permute.xlu1 %1068  ;;  %v1198_v31 = vpop.permute.xlu0 %1197 }
 0x267   : > { %2704 = vmatpush3.msra.mxu1 %v1281_v5  ;;  %1459 = vmatpush1.msra.mxu0 %v1113_v22  ;;  %v1075_v8 = vsel %vm435_vm6, %v3241_v33, %v1069_v24  ;;  %v1203_v32 = vsel %vm565_vm3, %v3225_v16, %v1198_v31 }
 0x268   : > { %1427 = vmatprep.mubr.f32.mxu1 %v3913_v0  ;;  %1460 = vmatprep.subr.mxu0 %v1075_v8 }
 0x269   : > { %2651 = vmatmul.mubr.msk.f32.gmra.mxu1 %vm713_vm9, %v1338_v14  ;;  %1461 = vmatpush1.msra.mxu0 %v1074_v62 }
 0x26a   : > { %1462 = vmatprep.subr.mxu0 %v1036_v26  ;;  %v991_v28 = vpop.permute.xlu1 %990  ;;  %2721 = vmatprep.mubr.msk.f32.mxu1 %vm713_vm9, %v1337_v20  ;;  %v1110_v35 = vpop.permute.xlu0 %1109 }
 0x26b   : > { %1463 = vmatpush1.msra.mxu0 %v1035_v29  ;;  %v997_v30 = vsel %vm355_vm8, %v989_v9, %v991_v28  ;;  %v1115_v37 = vsel %vm475_vm5, %v3256_v52, %v1110_v35 }
 0x26c   : > { %1464 = vmatprep.subr.mxu0 %v997_v30 }
 0x26d   : > { %1465 = vmatpush1.msra.mxu0 %v996_v25 }
 0x26e   : > { %2652 = vmatmul.mubr.msk.f32.vlgmr.msra.gmra.mxu0 %vm713_vm9, %v1337_v20  ;;  %v1237_v33 = vpop.permute.xlu1 %1236  ;;  %v1032_v16 = vpop.permute.xlu0 %1031 }
 0x26f   : > { %v1242_v34 = vsel %vm605_vm2, %v3223_v15, %v1237_v33  ;;  %1504 = vmatprep.mubr.f32.mxu0 %v3913_v0 }
 0x270   : > { %2705 = vmatprep.subr.mxu1 %v1242_v34 }
 0x271   : > { %2706 = vmatpush3.msra.mxu1 %v1242_v34 }
 0x272   : > { %2653 = vmatmul.mubr.msk.f32.gmra.mxu0 %vm713_vm9, %v1338_v14  ;;  %2707 = vmatprep.subr.mxu1 %v1203_v32  ;;  %v1159_v36 = vpop.permute.xlu1 %1158 }
 0x273   : > { %2708 = vmatpush3.msra.mxu1 %v1203_v32  ;;  %v1164_v27 = vsel %vm525_vm4, %v3227_v3, %v1159_v36  ;;  %v1037_v3 = vsel %vm395_vm7, %v3264_v56, %v1032_v16 }
 0x274   : > { %2709 = vmatprep.subr.mxu1 %v1164_v27 }
 0x275   : > { %2710 = vmatpush3.msra.mxu1 %v1164_v27 }
 0x276   : > { %2711 = vmatprep.subr.mxu1 %v3091_v47  ;;  %v1071_v15 = vpop.permute.xlu1 %1070 }
 0x277   : > { %2712 = vmatpush3.msra.mxu1 %v3091_v47  ;;  %v1076_v38 = vsel %vm435_vm6, %v1069_v24, %v1071_v15  ;;  %v3483_v24 = vld [vmem:[%s3910_s6] sm:$0x77] }
 0x278   : > { %2713 = vmatprep.subr.mxu1 %v1115_v37  ;;  %v3487_v22 = vcombine.high %v3483_v24, %v3483_v24 }
 0x279   : > { %2714 = vmatpush3.msra.mxu1 %v1115_v37 }
 0x27a   : > { %2715 = vmatprep.subr.mxu1 %v1076_v38  ;;  %v993_v39 = vpop.permute.xlu1 %992  ;;  %2656 = vmatprep.mubr.msk.f32.mxu0 %vm2359_vm10, %v3487_v22 }
 0x27b   : > { %2716 = vmatpush3.msra.mxu1 %v1076_v38  ;;  %v998_v40 = vsel %vm355_vm8, %v991_v28, %v993_v39  ;;  %v3384_v56 = vpop.permute.xlu0 %1348 }
 0x27c   : > { %2717 = vmatprep.subr.mxu1 %v1037_v3 }
 0x27d   : > { %2718 = vmatpush3.msra.mxu1 %v1037_v3 }
 0x27e   : > { %2719 = vmatprep.subr.mxu1 %v998_v40 }
 0x27f   : > { %2720 = vmatpush3.msra.mxu1 %v998_v40  ;;  %v3463_v19 = vpop.permute.xlu0 %2748 }
 0x280   : > { %2722 = vmatmul.mubr.msk.f32.vlgmr.msra.gmra.mxu1 %vm713_vm9, %v1338_v14 }
 0x281   : > { %2657 = vmatprep.mubr.msk.f32.mxu1 %vm2359_vm10, %v3487_v22 }
 0x283   : > { %v3472_v5 = vpop.permute.xlu0 %2758 }
 0x287   : > { %v3338_v47 = vpop.permute.xlu1 %1343 }
 0x28b   : > { %v3476_v23 = vpop.permute.xlu1 %2753 }
 0x28c   : > { %v2756_v25 = vunpack.i.h.bf16 %v3476_v23 }
 0x28f   : > { %v3499_v14 = vpop.permute.xlu1 %2763 }
 0x290   : > { %v2766_v27 = vunpack.i.h.bf16 %v3499_v14 }
 0x293   : > { %v3510_v29 = vpop.permute.xlu1 %2773 }
 0x325   : > { %v1423_v42 = vpop.f32.mrf.mxu1 }
 0x326   : > { %v1424_v43 = vadd.f32 %v1423_v42, %v3338_v47 }
 0x327   : > { %v1425_v53 = vpop.f32.mrf.mxu1 }
 0x328   : > { %v1586_v44 = vmax.f32 %v1424_v43, 0.0  ;;  %v1426_v54 = vadd.f32 %v1425_v53, %v3338_v47  ;;  %v2761_v43 = vunpack.i.h.bf16 %v3472_v5 }
 0x329   : > { %v1429_v50 = vpop.f32.mrf.mxu1 }
 0x32a   : > { %v3342_v45 = vmul.f32 %v1586_v44, %v3097_v49  ;;  %v1587_v57 = vmax.f32 %v1426_v54, 0.0  ;;  %v1430_v59 = vadd.f32 %v1429_v50, %v3384_v56 }
 0x32b   : > { %v1431_v9 = vpop.f32.mrf.mxu1 }
 0x32c   : > { %1798 = vrot.lane.b32.xlu0 %v3342_v45, %s2797_s16  ;;  %2128 = vrot.lane.b32.xlu1 %v3342_v45, %s2793_s12  ;;  %v3370_v58 = vmul.f32 %v1587_v57, %v3118_v55  ;;  %v1591_v60 = vmax.f32 %v1430_v59, 0.0  ;;  %v1432_v10 = vadd.f32 %v1431_v9, %v3384_v56 }
 0x32e   : > { %v1500_v46 = vpop.f32.mrf.mxu0  ;;  %v3396_v63 = vmul.f32 %v1591_v60, %v3097_v49  ;;  %v1592_v13 = vmax.f32 %v1432_v10, 0.0 }
 0x32f   : > { %v1501_v48 = vadd.f32 %v1500_v46, %v3338_v47 }
 0x330   : > { %1642 = vrot.lane.b32.xlu0 %v3342_v45, %s2799_s18  ;;  %2050 = vrot.lane.b32.xlu1 %v3342_v45, %s2794_s13  ;;  %v1502_v1 = vpop.f32.mrf.mxu0  ;;  %v3437_v17 = vmul.f32 %v1592_v13, %v3118_v55 }
 0x331   : > { %v1588_v51 = vmax.f32 %v1501_v48, 0.0  ;;  %v1503_v49 = vadd.f32 %v1502_v1, %v3338_v47 }
 0x332   : > { %v1506_v11 = vpop.f32.mrf.mxu0 }
 0x333   : > { %v3354_v52 = vmul.f32 %v1588_v51, %v3135_v61  ;;  %v1589_v2 = vmax.f32 %v1503_v49, 0.0  ;;  %v1507_v12 = vadd.f32 %v1506_v11, %v3384_v56 }
 0x334   : > { %1972 = vrot.lane.b32.xlu1 %v3342_v45, %s2795_s14  ;;  %v1508_v55 = vpop.f32.mrf.mxu0 }
 0x335   : > { %2132 = vrot.lane.b32.xlu0 %v3354_v52, %s2793_s12  ;;  %v3420_v6 = vmul.f32 %v1589_v2, %v3152_v7  ;;  %v1593_v4 = vmax.f32 %v1507_v12, 0.0 }
 0x337   : > { %v3444_v18 = vmul.f32 %v1593_v4, %v3135_v61  ;;  %v1509_v61 = vadd.f32 %v1508_v55, %v3384_v56 }
 0x338   : > { %1876 = vrot.lane.b32.xlu1 %v3342_v45, %s2796_s15 }
 0x339   : > { %2054 = vrot.lane.b32.xlu0 %v3354_v52, %s2794_s13  ;;  %v1594_v20 = vmax.f32 %v1509_v61, 0.0 }
 0x33b   : > { %v3470_v21 = vmul.f32 %v1594_v20, %v3152_v7  ;;  %v3495_v7 = vpop.permute.xlu0 %2768  ;;  %v2351_v20 = vld [vmem:[%s3911_s7] sm:$0x7] }
 0x33c   : > { %1720 = vrot.lane.b32.xlu1 %v3342_v45, %s2798_s17 }
 0x33d   : > { %1976 = vrot.lane.b32.xlu0 %v3354_v52, %s2795_s14 }
 0x33f   : > { %v3506_v26 = vpop.permute.xlu0 %2778 }
 0x340   : > { %2206 = vrot.lane.b32.xlu1 %v3342_v45, %s2792_s11  ;;  %v2723_v8 = vpop.f32.mrf.mxu1 }
 0x341   : > { %1878 = vrot.lane.b32.xlu0 %v3370_v58, %s2796_s15  ;;  %v1583_v62 = vadd.f32 %v2723_v8, %v3384_v56 }
 0x342   : > { %v1577_v28 = vpop.f32.mrf.mxu1 }
 0x343   : > { %v1595_v30 = vmax.f32 %v1583_v62, 0.0  ;;  %v1578_v31 = vadd.f32 %v1577_v28, %v3338_v47 }
 0x344   : > { %2130 = vrot.lane.b32.xlu1 %v3370_v58, %s2793_s12 }
 0x345   : > { %1722 = vrot.lane.b32.xlu0 %v3370_v58, %s2798_s17  ;;  %v3521_v33 = vmul.f32 %v1595_v30, %v3088_v41  ;;  %v1590_v35 = vmax.f32 %v1578_v31, 0.0 }
 0x347   : > { %v3541_v16 = vmul.f32 %v1590_v35, %v3088_v41  ;;  %v2751_v41 = vunpack.i.h.bf16 %v3463_v19 }
 0x348   : > { %2052 = vrot.lane.b32.xlu1 %v3370_v58, %s2794_s13 }
 0x349   : > { %2210 = vrot.lane.b32.xlu0 %v3354_v52, %s2792_s11 }
 0x34c   : > { %1974 = vrot.lane.b32.xlu1 %v3370_v58, %s2795_s14 }
 0x34d   : > { %1802 = vrot.lane.b32.xlu0 %v3354_v52, %s2797_s16 }
 0x350   : > { %1800 = vrot.lane.b32.xlu1 %v3370_v58, %s2797_s16 }
 0x351   : > { %1724 = vrot.lane.b32.xlu0 %v3354_v52, %s2798_s17 }
 0x354   : > { %1644 = vrot.lane.b32.xlu1 %v3370_v58, %s2799_s18 }
 0x355   : > { %2140 = vrot.lane.b32.xlu0 %v3396_v63, %s2793_s12 }
 0x358   : > { %2208 = vrot.lane.b32.xlu1 %v3370_v58, %s2792_s11 }
 0x359   : > { %2062 = vrot.lane.b32.xlu0 %v3396_v63, %s2794_s13 }
 0x35c   : > { %1880 = vrot.lane.b32.xlu1 %v3354_v52, %s2796_s15 }
 0x35d   : > { %1984 = vrot.lane.b32.xlu0 %v3396_v63, %s2795_s14 }
 0x360   : > { %1810 = vrot.lane.b32.xlu1 %v3396_v63, %s2797_s16 }
 0x361   : > { %1888 = vrot.lane.b32.xlu0 %v3396_v63, %s2796_s15 }
 0x364   : > { %1654 = vrot.lane.b32.xlu1 %v3396_v63, %s2799_s18 }
 0x365   : > { %1732 = vrot.lane.b32.xlu0 %v3396_v63, %s2798_s17 }
 0x368   : > { %2134 = vrot.lane.b32.xlu1 %v3420_v6, %s2793_s12 }
 0x369   : > { %2218 = vrot.lane.b32.xlu0 %v3396_v63, %s2792_s11 }
 0x36c   : > { %2056 = vrot.lane.b32.xlu1 %v3420_v6, %s2794_s13 }
 0x36d   : > { %1978 = vrot.lane.b32.xlu0 %v3420_v6, %s2795_s14 }
 0x370   : > { %1804 = vrot.lane.b32.xlu1 %v3420_v6, %s2797_s16 }
 0x371   : > { %1882 = vrot.lane.b32.xlu0 %v3420_v6, %s2796_s15 }
 0x374   : > { %1726 = vrot.lane.b32.xlu1 %v3420_v6, %s2798_s17 }
 0x375   : > { %2142 = vrot.lane.b32.xlu0 %v3437_v17, %s2793_s12 }
 0x378   : > { %2144 = vrot.lane.b32.xlu1 %v3444_v18, %s2793_s12 }
 0x379   : > { %2064 = vrot.lane.b32.xlu0 %v3437_v17, %s2794_s13 }
 0x37c   : > { %2066 = vrot.lane.b32.xlu1 %v3444_v18, %s2794_s13 }
 0x37d   : > { %1986 = vrot.lane.b32.xlu0 %v3437_v17, %s2795_s14 }
 0x380   : > { %1988 = vrot.lane.b32.xlu1 %v3444_v18, %s2795_s14 }
 0x381   : > { %1812 = vrot.lane.b32.xlu0 %v3437_v17, %s2797_s16 }
 0x384   : > { %1890 = vrot.lane.b32.xlu1 %v3437_v17, %s2796_s15 }
 0x385   : > { %1656 = vrot.lane.b32.xlu0 %v3437_v17, %s2799_s18 }
 0x388   : > { %1734 = vrot.lane.b32.xlu1 %v3437_v17, %s2798_s17 }
 0x389   : > { %2220 = vrot.lane.b32.xlu0 %v3437_v17, %s2792_s11 }
 0x38c   : > { %2222 = vrot.lane.b32.xlu1 %v3444_v18, %s2792_s11 }
 0x38d   : > { %2146 = vrot.lane.b32.xlu0 %v3470_v21, %s2793_s12 }
 0x390   : > { %1892 = vrot.lane.b32.xlu1 %v3444_v18, %s2796_s15 }
 0x391   : > { %2068 = vrot.lane.b32.xlu0 %v3470_v21, %s2794_s13 }
 0x394   : > { %1814 = vrot.lane.b32.xlu1 %v3444_v18, %s2797_s16 }
 0x395   : > { %1894 = vrot.lane.b32.xlu0 %v3470_v21, %s2796_s15 }
 0x398   : > { %1736 = vrot.lane.b32.xlu1 %v3444_v18, %s2798_s17 }
 0x399   : > { %1816 = vrot.lane.b32.xlu0 %v3470_v21, %s2797_s16 }
 0x39c   : > { %1990 = vrot.lane.b32.xlu1 %v3470_v21, %s2795_s14 }
 0x39d   : > { %1738 = vrot.lane.b32.xlu0 %v3470_v21, %s2798_s17 }
 0x39e   : > { %v3523_v34 = vpop.permute.xlu0 %1798  ;;  %v3525_v32 = vpop.permute.xlu1 %2128 }
 0x39f   : > { %v3529_v36 = vsel %vm435_vm6, %v2756_v25, %v3523_v34 }
 0x3a0   : > { %2148 = vrot.lane.b32.xlu1 %v3521_v33, %s2793_s12 }
 0x3a1   : > { %1992 = vrot.lane.b32.xlu0 %v3521_v33, %s2795_s14 }
 0x3a2   : > { %v3536_v15 = vpop.permute.xlu0 %1642  ;;  %v3538_v37 = vpop.permute.xlu1 %2050 }
 0x3a3   : > { %v3545_v38 = vsel %vm355_vm8, %v2766_v27, %v3536_v15 }
 0x3a4   : > { %2070 = vrot.lane.b32.xlu1 %v3521_v33, %s2794_s13 }
 0x3a5   : > { %2136 = vrot.lane.b32.xlu0 %v3541_v16, %s2793_s12 }
 0x3a6   : > { %v3551_v39 = vpop.permute.xlu1 %1972 }
 0x3a7   : > { %v3553_v3 = vpop.permute.xlu0 %2132 }
 0x3a8   : > { %1896 = vrot.lane.b32.xlu1 %v3521_v33, %s2796_s15 }
 0x3a9   : > { %2058 = vrot.lane.b32.xlu0 %v3541_v16, %s2794_s13 }
 0x3aa   : > { %v1877_v40 = vpop.permute.xlu1 %1876 }
 0x3ab   : > { %v3561_v47 = vsel %vm475_vm5, %v2751_v41, %v1877_v40  ;;  %v3563_v42 = vpop.permute.xlu0 %2054 }
 0x3ac   : > { %1818 = vrot.lane.b32.xlu1 %v3521_v33, %s2797_s16 }
 0x3ad   : > { %1660 = vrot.lane.b32.xlu0 %v3470_v21, %s2799_s18 }
 0x3ae   : > { %v1721_v44 = vpop.permute.xlu1 %1720 }
 0x3af   : > { %v3571_v46 = vsel %vm395_vm7, %v2761_v43, %v1721_v44  ;;  %v3573_v48 = vpop.permute.xlu0 %1976 }
 0x3b0   : > { %1980 = vrot.lane.b32.xlu1 %v3541_v16, %s2795_s14 }
 0x3b1   : > { %1646 = vrot.lane.b32.xlu0 %v3354_v52, %s2799_s18 }
 0x3b2   : > { %v2207_v51 = vpop.permute.xlu1 %2206 }
 0x3b3   : > { %v1879_v53 = vpop.permute.xlu0 %1878 }
 0x3b4   : > { %1658 = vrot.lane.b32.xlu1 %v3444_v18, %s2799_s18  ;;  %v3582_v54 = vsel %vm475_vm5, %v1877_v40, %v1879_v53 }
 0x3b5   : > { %2226 = vrot.lane.b32.xlu0 %v3521_v33, %s2792_s11 }
 0x3b6   : > { %v2131_v57 = vpop.permute.xlu1 %2130 }
 0x3b7   : > { %v1723_v50 = vpop.permute.xlu0 %1722 }
 0x3b8   : > { %1740 = vrot.lane.b32.xlu1 %v3521_v33, %s2798_s17  ;;  %v3589_v56 = vsel %vm395_vm7, %v1721_v44, %v1723_v50 }
 0x3b9   : > { %2212 = vrot.lane.b32.xlu0 %v3420_v6, %s2792_s11 }
 0x3ba   : > { %v2053_v59 = vpop.permute.xlu1 %2052 }
 0x3bb   : > { %v3593_v60 = vpop.permute.xlu0 %2210 }
 0x3bc   : > { %1648 = vrot.lane.b32.xlu1 %v3420_v6, %s2799_s18 }
 0x3bd   : > { %1884 = vrot.lane.b32.xlu0 %v3541_v16, %s2796_s15 }
 0x3be   : > { %v3599_v1 = vpop.permute.xlu1 %1974 }
 0x3bf   : > { %v3601_v49 = vpop.permute.xlu0 %1802 }
 0x3c0   : > { %3920 = vst [vmem:[#allocation4_spill] sm:$0xff] %v3601_v49  ;;  %2224 = vrot.lane.b32.xlu1 %v3470_v21, %s2792_s11 }
 0x3c1   : > { %1806 = vrot.lane.b32.xlu0 %v3541_v16, %s2797_s16 }
 0x3c2   : > { %v3607_v2 = vpop.permute.xlu1 %1800 }
 0x3c3   : > { %v3612_v9 = vsel %vm435_vm6, %v3607_v2, %v3601_v49  ;;  %v3614_v10 = vpop.permute.xlu0 %1724  ;;  %v2152_v49 = vsel %vm605_vm2, %v3525_v32, %v2131_v57 }
 0x3c4   : > { %3921 = vst [vmem:[#allocation5_spill] sm:$0xff] %v3612_v9  ;;  %3922 = vst [vmem:[#allocation6_spill] sm:$0xff] %v3614_v10  ;;  %v3618_v11 = vsel %vm395_vm7, %v1723_v50, %v3614_v10  ;;  %1662 = vrot.lane.b32.xlu1 %v3521_v33, %s2799_s18  ;;  %v2153_v9 = vsel %vm605_vm2, %v2131_v57, %v3553_v3 }
 0x3c5   : > { %3923 = vst [vmem:[#allocation7_spill] sm:$0xff] %v3618_v11  ;;  %1728 = vrot.lane.b32.xlu0 %v3541_v16, %s2798_s17 }
 0x3c6   : > { %v3624_v12 = vpop.permute.xlu1 %1644 }
 0x3c7   : > { %v2141_v13 = vpop.permute.xlu0 %2140 }
 0x3c8   : > { %2214 = vrot.lane.b32.xlu1 %v3541_v16, %s2792_s11 }
 0x3c9   : > { %1650 = vrot.lane.b32.xlu0 %v3541_v16, %s2799_s18 }
 0x3ca   : > { %v3630_v4 = vpop.permute.xlu1 %2208 }
 0x3cb   : > { %v3634_v55 = vsel %vm645_vm1, %v2207_v51, %v3630_v4  ;;  %v2063_v61 = vpop.permute.xlu0 %2062 }
 0x3cc   : > { %2228 = vrot.lane.b32.xlu1 %v3913_v0, %s2792_s11 }
 0x3cd   : > { %2216 = vrot.lane.b32.xlu0 %v3913_v0, %s2792_s11  ;;  %s2725_s11 = smul.u32 20, %s3938_s28 }
 0x3ce   : > { %v3643_v8 = vpop.permute.xlu1 %1880 }
 0x3cf   : > { %3924 = vst [vmem:[#allocation8_spill] sm:$0xff] %v3643_v8  ;;  %v3647_v62 = vsel %vm475_vm5, %v1879_v53, %v3643_v8  ;;  %v1985_v28 = vpop.permute.xlu0 %1984  ;;  %s305_s16 = scalar_lea.vmem %s3912_s8, %s2725_s11 }
 0x3d0   : > { %3925 = vst [vmem:[#allocation9_spill] sm:$0xff] %v3647_v62  ;;  %2354 = vperm.xlu1 %2746, %v2351_v20  }
 0x3d2   : > { %v1811_v30 = vpop.permute.xlu1 %1810 }
 0x3d3   : > { %v1889_v31 = vpop.permute.xlu0 %1888 }
 0x3d6   : > { %v3649_v25 = vpop.permute.xlu1 %1654 }
 0x3d7   : > { %v3651_v35 = vpop.permute.xlu0 %1732 }
 0x3da   : > { %v3653_v27 = vpop.permute.xlu1 %2134 }
 0x3db   : > { %v3655_v41 = vpop.permute.xlu0 %2218 }
 0x3de   : > { %v3657_v40 = vpop.permute.xlu1 %2056 }
 0x3df   : > { %v3659_v43 = vpop.permute.xlu0 %1978 }
 0x3e2   : > { %v3661_v44 = vpop.permute.xlu1 %1804 }
 0x3e3   : > { %3926 = vst [vmem:[#allocation10_spill] sm:$0xff] %v3661_v44  ;;  %v3663_v51 = vpop.permute.xlu0 %1882 }
 0x3e6   : > { %v3665_v53 = vpop.permute.xlu1 %1726 }
 0x3e7   : > { %3927 = vst [vmem:[#allocation11_spill] sm:$0xff] %v3665_v53  ;;  %v2143_v50 = vpop.permute.xlu0 %2142 }
 0x3e8   : > { %v2157_v10 = vsel %vm605_vm2, %v2141_v13, %v2143_v50 }
 0x3ea   : > { %v3667_v20 = vpop.permute.xlu1 %2144 }
 0x3eb   : > { %v2065_v0 = vpop.permute.xlu0 %2064  ;;  %v2158_v11 = vsel %vm605_vm2, %v2143_v50, %v3667_v20 }
 0x3ec   : > { %2362 = vmatprep.subr.mxu0 %v2158_v11  ;;  %v2079_v8 = vsel %vm565_vm3, %v2063_v61, %v2065_v0  ;;  %v2074_v11 = vsel %vm565_vm3, %v3538_v37, %v2053_v59  ;;  %v1996_v37 = vsel %vm525_vm4, %v3551_v39, %v3599_v1  ;;  %v2750_v61 = vunpack.i.l.bf16 %v3463_v19 }
 0x3ed   : > { %2363 = vmatpush1.msra.mxu0 %v2157_v10  ;;  %v2075_v10 = vsel %vm565_vm3, %v2053_v59, %v3563_v42 }
 0x3ee   : > { %2364 = vmatprep.subr.mxu0 %v2153_v9  ;;  %v3676_v44 = vpop.permute.xlu1 %2066 }
 0x3ef   : > { %v1987_v53 = vpop.permute.xlu0 %1986  ;;  %2365 = vmatpush1.msra.mxu0 %v2152_v49  ;;  %v2080_v62 = vsel %vm565_vm3, %v2065_v0, %v3676_v44  ;;  %v1997_v0 = vsel %vm525_vm4, %v3599_v1, %v3573_v48  ;;  %v1903_v1 = vsel %vm475_vm5, %v2750_v61, %v1889_v31 }
 0x3f0   : > { %2366 = vmatprep.subr.mxu0 %v2080_v62  ;;  %v2001_v9 = vsel %vm525_vm4, %v1985_v28, %v1987_v53  ;;  %v1821_v28 = vsel %vm435_vm6, %v3523_v34, %v3607_v2 }
 0x3f1   : > { %2367 = vmatpush1.msra.mxu0 %v2079_v8 }
 0x3f2   : > { %2368 = vmatprep.subr.mxu0 %v2075_v10  ;;  %v3685_v32 = vpop.permute.xlu1 %1988 }
 0x3f3   : > { %v3687_v57 = vpop.permute.xlu0 %1812  ;;  %2369 = vmatpush1.msra.mxu0 %v2074_v11  ;;  %v2002_v49 = vsel %vm525_vm4, %v1987_v53, %v3685_v32  ;;  %v2765_v53 = vunpack.i.l.bf16 %v3499_v14  ;;  %v1665_v14 = vsel %vm355_vm8, %v3536_v15, %v3624_v12  ;;  %v2770_v11 = vunpack.i.l.bf16 %v3495_v7 }
 0x3f4   : > { %2370 = vmatprep.subr.mxu0 %v2002_v49 }
 0x3f5   : > { %2371 = vmatpush1.msra.mxu0 %v2001_v9  ;;  %v1669_v2 = vsel %vm355_vm8, %v2765_v53, %v3649_v25 }
 0x3f6   : > { %2372 = vmatprep.subr.mxu0 %v1997_v0  ;;  %v3698_v59 = vpop.permute.xlu1 %1890 }
 0x3f7   : > { %v3700_v13 = vpop.permute.xlu0 %1656  ;;  %2373 = vmatpush1.msra.mxu0 %v1996_v37  ;;  %v1904_v39 = vsel %vm475_vm5, %v1889_v31, %v3698_v59 }
 0x3f8   : > { %2374 = vmatprep.subr.mxu0 %v3437_v17  ;;  %v2755_v17 = vunpack.i.l.bf16 %v3476_v23  ;;  %v2760_v23 = vunpack.i.l.bf16 %v3472_v5 }
 0x3f9   : > { %2375 = vmatpush1.msra.mxu0 %v3396_v63 }
 0x3fa   : > { %2376 = vmatprep.subr.mxu0 %v3370_v58  ;;  %v3706_v8 = vpop.permute.xlu1 %1734  ;;  %v1826_v58 = vsel %vm435_vm6, %v1811_v30, %v3687_v57 }
 0x3fb   : > { %v2221_v62 = vpop.permute.xlu0 %2220  ;;  %2377 = vmatpush1.msra.mxu0 %v3342_v45  ;;  %v1825_v45 = vsel %vm435_vm6, %v2755_v17, %v1811_v30  ;;  %v1747_v30 = vsel %vm395_vm7, %v2760_v23, %v3651_v35 }
 0x3fc   : > { %2378 = vmatprep.subr.mxu0 %v1904_v39  ;;  %v2235_v50 = vsel %vm645_vm1, %v3655_v41, %v2221_v62 }
 0x3fd   : > { %2379 = vmatpush1.msra.mxu0 %v1903_v1  ;;  %v2776_v1 = vunpack.i.h.bf16 %v3510_v29 }
 0x3fe   : > { %2380 = vmatprep.subr.mxu0 %v3582_v54  ;;  %v3714_v63 = vpop.permute.xlu1 %2222 }
 0x3ff   : > { %v2147_v19 = vpop.permute.xlu0 %2146  ;;  %2381 = vmatpush1.msra.mxu0 %v3561_v47  ;;  %v1748_v47 = vsel %vm395_vm7, %v3651_v35, %v3706_v8 }
 0x400   : > { %2382 = vmatprep.subr.mxu0 %v1826_v58  ;;  %v2159_v0 = vsel %vm605_vm2, %v3667_v20, %v2147_v19  ;;  %v2154_v20 = vsel %vm605_vm2, %v3553_v3, %v3653_v27  ;;  %v2780_v3 = vunpack.i.l.bf16 %v3506_v26 }
 0x401   : > { %2383 = vmatpush1.msra.mxu0 %v1825_v45 }
 0x402   : > { %v3724_v31 = vpop.permute.xlu1 %1892  ;;  %2384 = vmatprep.subr.mxu0 %v1821_v28  ;;  %v2076_v28 = vsel %vm565_vm3, %v3563_v42, %v3657_v40  ;;  %v2781_v42 = vunpack.i.h.bf16 %v3506_v26 }
 0x403   : > { %v2069_v54 = vpop.permute.xlu0 %2068  ;;  %2385 = vmatpush1.msra.mxu0 %v3529_v36  ;;  %v1670_v36 = vsel %vm355_vm8, %v3649_v25, %v3700_v13  ;;  %v2231_v25 = vsel %vm645_vm1, %v3630_v4, %v3593_v60 }
 0x404   : > { %2386 = vmatprep.subr.mxu0 %v1748_v47  ;;  %v2081_v58 = vsel %vm565_vm3, %v3676_v44, %v2069_v54 }
 0x405   : > { %2387 = vmatpush1.msra.mxu0 %v1747_v30 }
 0x406   : > { %v3733_v34 = vpop.permute.xlu1 %1814  ;;  %2388 = vmatprep.subr.mxu0 %v3589_v56 }
 0x407   : > { %v3736_v5 = vpop.permute.xlu0 %1894  ;;  %2389 = vmatpush1.msra.mxu0 %v3571_v46  ;;  %v2236_v46 = vsel %vm645_vm1, %v2221_v62, %v3714_v63 }
 0x408   : > { %2390 = vmatprep.subr.mxu0 %v1670_v36 }
 0x409   : > { %2391 = vmatpush1.msra.mxu0 %v1669_v2 }
 0x40a   : > { %v3747_v35 = vpop.permute.xlu1 %1736  ;;  %2392 = vmatprep.subr.mxu0 %v1665_v14 }
 0x40b   : > { %v3749_v56 = vpop.permute.xlu0 %1816  ;;  %2393 = vmatpush1.msra.mxu0 %v3545_v38  ;;  %v3928_v38 = vmov 0.0  }
 0x40c   : > { %2422 = vmatprep.subr.mxu0 %v2236_v46 }
 0x40d   : > { %2423 = vmatpush2.msra.mxu0 %v2235_v50  ;;  %v3931_v50 = vld [vmem:[#allocation10_spill] sm:$0xff] }
 0x40e   : > { %v1991_v15 = vpop.permute.xlu1 %1990  ;;  %2424 = vmatprep.subr.mxu0 %v2231_v25  ;;  %v3932_v25 = vld [vmem:[#allocation4_spill] sm:$0xff] }
 0x40f   : > { %v3759_v10 = vpop.permute.xlu0 %1738  ;;  %2425 = vmatpush2.msra.mxu0 %v3634_v55  ;;  %v2771_v55 = vunpack.i.h.bf16 %v3495_v7  ;;  %v2003_v47 = vsel %vm525_vm4, %v3685_v32, %v1991_v15  ;;  %v1998_v32 = vsel %vm525_vm4, %v3573_v48, %v3659_v43 }
 0x410   : > { %2427 = vmatmul.mubr.f32.vlgmr.msra.gmra.mxu0 %v3483_v24  ;;  %2504 = vmatprep.subr.mxu0 %v3928_v38 }
 0x411   : > { %2658 = vmatprep.mubr.msk.f32.mxu0 %vm2359_vm10, %v3487_v22  ;;  %v2775_v22 = vunpack.i.l.bf16 %v3510_v29 }
 0x412   : > { %v2149_v41 = vpop.permute.xlu1 %2148 }
 0x413   : > { %v2161_v49 = vsel %vm605_vm2, %v2149_v41, %v2770_v11  ;;  %v1993_v9 = vpop.permute.xlu0 %1992  ;;  %v2160_v4 = vsel %vm605_vm2, %v2147_v19, %v2149_v41  ;;  %v3933_v41 = vld [vmem:[#allocation5_spill] sm:$0xff] }
 0x414   : > { %2433 = vmatprep.subr.mxu1 %v2160_v4  ;;  %2505 = vmatpush1.msra.mxu0 %v2161_v49  ;;  %v2005_v44 = vsel %vm525_vm4, %v1993_v9, %v2780_v3  ;;  %v1750_v49 = vsel %vm395_vm7, %v3747_v35, %v3759_v10  ;;  %v3934_v4 = vld [vmem:[#allocation11_spill] sm:$0xff] }
 0x415   : > { %2434 = vmatpush1.msra.mxu1 %v2159_v0  ;;  %2506 = vmatprep.subr.mxu0 %v3928_v38  ;;  %v3935_v0 = vld [vmem:[#allocation6_spill] sm:$0xff] }
 0x416   : > { %v2071_v37 = vpop.permute.xlu1 %2070 }
 0x417   : > { %v2137_v61 = vpop.permute.xlu0 %2136  ;;  %v2083_v17 = vsel %vm565_vm3, %v2071_v37, %v2775_v22  ;;  %v2082_v19 = vsel %vm565_vm3, %v2069_v54, %v2071_v37  ;;  %v2004_v54 = vsel %vm525_vm4, %v1991_v15, %v1993_v9  ;;  %v1823_v15 = vsel %vm435_vm6, %v3932_v25, %v3931_v50 }
 0x418   : > { %v2156_v62 = vsel %vm605_vm2, %v2137_v61, %v2771_v55  ;;  %v2155_v39 = vsel %vm605_vm2, %v3653_v27, %v2137_v61  ;;  %v1745_v55 = vsel %vm395_vm7, %v3935_v0, %v3934_v4 }
 0x419   : > { %2435 = vmatprep.subr.mxu1 %v2155_v39  ;;  %2507 = vmatpush1.msra.mxu0 %v2156_v62 }
 0x41a   : > { %2436 = vmatpush1.msra.mxu1 %v2154_v20  ;;  %v1897_v7 = vpop.permute.xlu1 %1896  ;;  %2508 = vmatprep.subr.mxu0 %v3928_v38 }
 0x41b   : > { %v2059_v45 = vpop.permute.xlu0 %2058  ;;  %2437 = vmatprep.subr.mxu1 %v2082_v19  ;;  %2509 = vmatpush1.msra.mxu0 %v2083_v17  ;;  %v1907_v48 = vsel %vm475_vm5, %v3736_v5, %v1897_v7 }
 0x41c   : > { %v2078_v27 = vsel %vm565_vm3, %v2059_v45, %v2776_v1  ;;  %2438 = vmatpush1.msra.mxu1 %v2081_v58  ;;  %2510 = vmatprep.subr.mxu0 %v3928_v38  ;;  %v2077_v29 = vsel %vm565_vm3, %v3657_v40, %v2059_v45 }
 0x41d   : > { %2439 = vmatprep.subr.mxu1 %v2077_v29  ;;  %2511 = vmatpush1.msra.mxu0 %v2078_v27 }
 0x41e   : > { %2440 = vmatpush1.msra.mxu1 %v2076_v28  ;;  %v1819_v23 = vpop.permute.xlu1 %1818  ;;  %2512 = vmatprep.subr.mxu0 %v3928_v38 }
 0x41f   : > { %v3799_v30 = vpop.permute.xlu0 %1660  ;;  %2441 = vmatprep.subr.mxu1 %v2004_v54  ;;  %2513 = vmatpush1.msra.mxu0 %v2005_v44 }
 0x420   : > { %2442 = vmatpush1.msra.mxu1 %v2003_v47  ;;  %2514 = vmatprep.subr.mxu0 %v3928_v38 }
 0x422   : > { %v1981_v40 = vpop.permute.xlu1 %1980 }
 0x423   : > { %v2000_v53 = vsel %vm525_vm4, %v1981_v40, %v2781_v42  ;;  %v3804_v36 = vpop.permute.xlu0 %1646  ;;  %v1999_v2 = vsel %vm525_vm4, %v3659_v43, %v1981_v40 }
 0x424   : > { %2443 = vmatprep.subr.mxu1 %v1999_v2  ;;  %2515 = vmatpush1.msra.mxu0 %v2000_v53  ;;  %v1666_v20 = vsel %vm355_vm8, %v3624_v12, %v3804_v36 }
 0x425   : > { %2444 = vmatpush1.msra.mxu1 %v1998_v32  ;;  %2516 = vmatprep.subr.mxu0 %v3928_v38 }
 0x426   : > { %2445 = vmatprep.subr.mxu1 %v3470_v21  ;;  %v1659_v26 = vpop.permute.xlu1 %1658  ;;  %2517 = vmatpush1.msra.mxu0 %v3521_v33  ;;  %v1906_v21 = vsel %vm475_vm5, %v3724_v31, %v3736_v5  ;;  %v1828_v5 = vsel %vm435_vm6, %v3733_v34, %v3749_v56 }
 0x427   : > { %v3814_v14 = vpop.permute.xlu0 %2226  ;;  %2446 = vmatpush1.msra.mxu1 %v3444_v18  ;;  %2518 = vmatprep.subr.mxu0 %v3928_v38  ;;  %v1905_v18 = vsel %vm475_vm5, %v3698_v59, %v3724_v31  ;;  %v1827_v59 = vsel %vm435_vm6, %v3687_v57, %v3733_v34  ;;  %v1749_v57 = vsel %vm395_vm7, %v3706_v8, %v3747_v35  ;;  %v3936_v8 = vld [vmem:[#allocation7_spill] sm:$0xff] }
 0x428   : > { %2447 = vmatprep.subr.mxu1 %v3420_v6  ;;  %2519 = vmatpush1.msra.mxu0 %v3541_v16  ;;  %v3929_v16 = vld [vmem:[#allocation8_spill] sm:$0xff]  ;;  %v1829_v34 = vsel %vm435_vm6, %v3749_v56, %v1819_v23  ;;  %v1672_v35 = vsel %vm355_vm8, %v1659_v26, %v3799_v30  ;;  %v1671_v56 = vsel %vm355_vm8, %v3700_v13, %v1659_v26 }
 0x429   : > { %2448 = vmatpush1.msra.mxu1 %v3354_v52  ;;  %2520 = vmatprep.subr.mxu0 %v3928_v38  ;;  %v1901_v43 = vsel %vm475_vm5, %v3929_v16, %v3663_v51  ;;  %v3930_v52 = vld [vmem:[#allocation9_spill] sm:$0xff] }
 0x42a   : > { %2449 = vmatprep.subr.mxu1 %v1906_v21  ;;  %v1741_v33 = vpop.permute.xlu1 %1740  ;;  %2521 = vmatpush1.msra.mxu0 %v1907_v48 }
 0x42b   : > { %v2213_v6 = vpop.permute.xlu0 %2212  ;;  %2450 = vmatpush1.msra.mxu1 %v1905_v18  ;;  %2522 = vmatprep.subr.mxu0 %v3928_v38  ;;  %v1751_v61 = vsel %vm395_vm7, %v3759_v10, %v1741_v33 }
 0x42c   : > { %2451 = vmatprep.subr.mxu1 %v1901_v43  ;;  %v2232_v58 = vsel %vm645_vm1, %v3593_v60, %v2213_v6 }
 0x42d   : > { %2452 = vmatpush1.msra.mxu1 %v3930_v52 }
 0x42e   : > { %2453 = vmatprep.subr.mxu1 %v1828_v5  ;;  %v1649_v31 = vpop.permute.xlu1 %1648 }
 0x42f   : > { %v1885_v46 = vpop.permute.xlu0 %1884  ;;  %2454 = vmatpush1.msra.mxu1 %v1827_v59  ;;  %v1667_v39 = vsel %vm355_vm8, %v3804_v36, %v1649_v31 }
 0x430   : > { %v1902_v11 = vsel %vm475_vm5, %v3663_v51, %v1885_v46  ;;  %2455 = vmatprep.subr.mxu1 %v1823_v15 }
 0x431   : > { %2456 = vmatpush1.msra.mxu1 %v3933_v41  ;;  %2523 = vmatpush1.msra.mxu0 %v1902_v11 }
 0x432   : > { %2457 = vmatprep.subr.mxu1 %v1750_v49  ;;  %v2225_v9 = vpop.permute.xlu1 %2224  ;;  %2524 = vmatprep.subr.mxu0 %v3928_v38 }
 0x433   : > { %v1807_v51 = vpop.permute.xlu0 %1806  ;;  %2458 = vmatpush1.msra.mxu1 %v1749_v57  ;;  %2525 = vmatpush1.msra.mxu0 %v1829_v34  ;;  %v2238_v10 = vsel %vm645_vm1, %v2225_v9, %v3814_v14  ;;  %v2237_v1 = vsel %vm645_vm1, %v3714_v63, %v2225_v9 }
 0x434   : > { %v1824_v37 = vsel %vm435_vm6, %v3931_v50, %v1807_v51  ;;  %2459 = vmatprep.subr.mxu1 %v1745_v55  ;;  %2526 = vmatprep.subr.mxu0 %v3928_v38 }
 0x435   : > { %2460 = vmatpush1.msra.mxu1 %v3936_v8  ;;  %2527 = vmatpush1.msra.mxu0 %v1824_v37 }
 0x436   : > { %2461 = vmatprep.subr.mxu1 %v1672_v35  ;;  %v1663_v22 = vpop.permute.xlu1 %1662  ;;  %2528 = vmatprep.subr.mxu0 %v3928_v38 }
 0x437   : > { %v1729_v62 = vpop.permute.xlu0 %1728  ;;  %2462 = vmatpush1.msra.mxu1 %v1671_v56  ;;  %2529 = vmatpush1.msra.mxu0 %v1751_v61  ;;  %v1673_v17 = vsel %vm355_vm8, %v3799_v30, %v1663_v22 }
 0x438   : > { %v1746_v13 = vsel %vm395_vm7, %v3934_v4, %v1729_v62  ;;  %2463 = vmatprep.subr.mxu1 %v1667_v39  ;;  %2530 = vmatprep.subr.mxu0 %v3928_v38 }
 0x439   : > { %2464 = vmatpush1.msra.mxu1 %v1666_v20  ;;  %2531 = vmatpush1.msra.mxu0 %v1746_v13 }
 0x43a   : > { %2493 = vmatprep.subr.mxu1 %v2238_v10  ;;  %v2215_v7 = vpop.permute.xlu1 %2214  ;;  %2532 = vmatprep.subr.mxu0 %v3928_v38 }
 0x43b   : > { %v1651_v12 = vpop.permute.xlu0 %1650  ;;  %2494 = vmatpush2.msra.mxu1 %v2237_v1  ;;  %2533 = vmatpush1.msra.mxu0 %v1673_v17  ;;  %v2233_v19 = vsel %vm645_vm1, %v2213_v6, %v2215_v7 }
 0x43c   : > { %v1668_v45 = vsel %vm355_vm8, %v1649_v31, %v1651_v12  ;;  %2495 = vmatprep.subr.mxu1 %v2233_v19  ;;  %2534 = vmatprep.subr.mxu0 %v3928_v38 }
 0x43d   : > { %2496 = vmatpush2.msra.mxu1 %v2232_v58  ;;  %2535 = vmatpush1.msra.mxu0 %v1668_v45 }
 0x43e   : > { %2498 = vmatmul.mubr.f32.vlgmr.msra.gmra.mxu1 %v3483_v24  ;;  %v2229_v63 = vpop.permute.xlu1 %2228  ;;  %2564 = vmatprep.subr.mxu0 %v3928_v38 }
 0x43f   : > { %v2239_v3 = vsel %vm645_vm1, %v3814_v14, %v2229_v63  ;;  %v2217_v27 = vpop.permute.xlu0 %2216 }
 0x440   : > { %v2234_v29 = vsel %vm645_vm1, %v2215_v7, %v2217_v27  ;;  %2565 = vmatpush2.msra.mxu0 %v2239_v3 }
 0x441   : > { %2566 = vmatprep.subr.mxu0 %v3928_v38 }
 0x442   : > { %2567 = vmatpush2.msra.mxu0 %v2234_v29 }
 0x443   : > { %2569 = vmatmul.mubr.f32.vlgmr.msra.gmra.mxu0 %v3483_v24 }
 0x44b   : > { %v2355_v28 = vpop.permute.xlu1 %2354 }
 0x4d0   : > { %v2428_v60 = vpop.f32.mrf.mxu0 }
 0x4d1   : > { %v2429_v23 = vadd.f32 %v2428_v60, %v2355_v28 }
 0x4d2   : > { %v2430_v44 = vpop.f32.mrf.mxu0 }
 0x4d3   : > { %v2431_v54 = vadd.f32 %v2430_v44, %v2355_v28 }
 0x4d5   : > { %v2578_v47 = vcombine.low %v2429_v23, %v2431_v54 }
 0x4d7   : > { %2582 = vst [vmem:[%s305_s16] sm:$0x77] %v2578_v47 }
 0x4fe   : > { %v2499_v30 = vpop.f32.mrf.mxu1 }
 0x4ff   : > { %v2500_v40 = vadd.f32 %v2499_v30, %v2355_v28 }
 0x500   : > { %v2501_v42 = vpop.f32.mrf.mxu1 }
 0x501   : > { %v2502_v53 = vadd.f32 %v2501_v42, %v2355_v28 }
 0x503   : > { %v2579_v38 = vcombine.low %v2500_v40, %v2502_v53  ;;  %v2570_v36 = vpop.f32.mrf.mxu0 }
 0x504   : > { %v2571_v2 = vadd.f32 %v2570_v36, %v2355_v28 }
 0x505   : > { %2583 = vst [vmem:[%s305_s16 + $0x8] sm:$0x77] %v2579_v38  ;;  %v2572_v24 = vpop.f32.mrf.mxu0 }
 0x506   : > { %2584 = vst [vmem:[%s305_s16 + $0x10] sm:$0x7] %v2571_v2 }
 0x507 PF: > { %s18_s27 = sadd.s32 1, %s2789_s27  }
 0x508   : > { %p15_p4 = scmp.ge.s32.totalorder %s18_s27, 4  }
 0x50a   :  { %17 = sbr.rel (!%p15_p4) target bundleno = 1 (0x1), region = 82 }

</bundles_post_ra>
